<compile_context>
chip_gen: v7x
topology: tpu7x:2x2x1
jax: 0.10.0
libtpu: 0.0.40
codegen_flags: <defaults>
</compile_context>

<pallas_src>
import functools
from collections import OrderedDict

import jax
import jax.numpy as jnp
from jax.experimental import pallas as pl
from jax.experimental.pallas import tpu as pltpu


def _round_up(x, m):
    return ((x + m - 1) // m) * m


# ----------------------------------------------------------------------------
# Pallas kernel: tiled matmul + bias (+ optional fused skip-add) (+ ReLU)
# ----------------------------------------------------------------------------
def _matmul_kernel(x_ref, w_ref, b_ref, *rest, apply_relu, has_skip):
    """Grid = (M_tiles, K_tiles).  Accumulate over K into a VMEM scratch,
    add bias (+ skip) (+ ReLU) and store on the last K step."""
    if has_skip:
        skip_ref, o_ref, acc_ref = rest
    else:
        skip_ref = None
        o_ref, acc_ref = rest

    k = pl.program_id(1)

    @pl.when(k == 0)
    def _init():
        acc_ref[...] = jnp.zeros_like(acc_ref)

    acc_ref[...] += jnp.dot(x_ref[...], w_ref[...],
                            preferred_element_type=jnp.float32)

    @pl.when(k == pl.num_programs(1) - 1)
    def _finalize():
        out = acc_ref[...] + b_ref[...]          # b is (1, Npad), broadcasts
        if has_skip:
            out = out + skip_ref[...]            # fused FPN top-down merge
        if apply_relu:
            out = jnp.maximum(out, 0.0)
        o_ref[...] = out.astype(o_ref.dtype)


def _pallas_matmul(x, w, b, skip=None, apply_relu=False):
    """o = relu?(x @ w + b [+ skip]).  x:(M,K) w:(K,N) b:(N,) skip:(M,N)|None.
    Inputs are cast to bf16 for the MXU; accumulation is f32.  Output channels
    are padded to a multiple of 128 inside the kernel (lane-dense stores) and
    sliced back to N before returning."""
    M, K = x.shape
    K2, N = w.shape
    assert K == K2, (K, K2)

    # ---- tile sizes (sized well under the 32 MiB scoped / 64 MiB v7x VMEM)
    tm = min(512, _round_up(M, 16))          # bf16 sublane-friendly M tile
    Npad = _round_up(N, 128)                 # lane-dense output / weights
    if K <= 1024:
        tk = _round_up(K, 16)                # single K step, padded for bf16
    else:
        tk = 512                             # multi-step K reduction
    Kp = _round_up(K, tk)
    Mp = _round_up(M, tm)

    # ---- pad + cast (fused into the surrounding jit)
    xp = jnp.pad(x.astype(jnp.bfloat16), ((0, Mp - M), (0, Kp - K)))
    wp = jnp.pad(w.astype(jnp.bfloat16), ((0, Kp - K), (0, Npad - N)))
    bp = jnp.pad(b.astype(jnp.float32).reshape(1, N), ((0, 0), (0, Npad - N)))

    operands = [xp, wp, bp]
    in_specs = [
        pl.BlockSpec((tm, tk), lambda i, k: (i, k)),
        pl.BlockSpec((tk, Npad), lambda i, k: (k, 0)),
        pl.BlockSpec((1, Npad), lambda i, k: (0, 0)),
    ]
    has_skip = skip is not None
    if has_skip:
        sp = jnp.pad(skip.astype(jnp.float32), ((0, Mp - M), (0, Npad - N)))
        operands.append(sp)
        in_specs.append(pl.BlockSpec((tm, Npad), lambda i, k: (i, 0)))

    kernel = functools.partial(_matmul_kernel,
                               apply_relu=apply_relu, has_skip=has_skip)

    out = pl.pallas_call(
        kernel,
        out_shape=jax.ShapeDtypeStruct((Mp, Npad), jnp.float32),
        grid=(Mp // tm, Kp // tk),
        in_specs=in_specs,
        out_specs=pl.BlockSpec((tm, Npad), lambda i, k: (i, 0)),
        scratch_shapes=[pltpu.VMEM((tm, Npad), jnp.float32)],
        compiler_params=pltpu.CompilerParams(
            dimension_semantics=("parallel", "arbitrary"),
            vmem_limit_bytes=32 * 1024 * 1024,
        ),
    )(*operands)
    return out[:M, :N]


# ----------------------------------------------------------------------------
# Conv helpers (im2col glue in JAX, matmul in Pallas)
# ----------------------------------------------------------------------------
def _im2col(x, kh, kw, stride, pad):
    """x: (N, H, W, C) -> (N*Ho*Wo, kh*kw*C).  Stride is handled directly in
    the patch slicing (no wasted stride-1 compute).  Column order matches
    w.reshape(kh*kw*Cin, Cout)."""
    if pad > 0:
        x = jnp.pad(x, ((0, 0), (pad, pad), (pad, pad), (0, 0)))
    n, hp, wp, c = x.shape
    ho = (hp - kh) // stride + 1
    wo = (wp - kw) // stride + 1
    cols = []
    for i in range(kh):
        for j in range(kw):
            cols.append(x[:, i:i + stride * ho:stride,
                          j:j + stride * wo:stride, :])
    patches = jnp.concatenate(cols, axis=-1)          # (N, Ho, Wo, kh*kw*C)
    return patches.reshape(n * ho * wo, kh * kw * c), (n, ho, wo)


def conv2d(x, w, b, stride=1, pad=0, relu=False, skip=None):
    """NHWC conv via im2col + fused Pallas matmul.  w: (KH,KW,Cin,Cout),
    b: (Cout,).  Optional `skip` (NHWC, same shape as output) is added inside
    the kernel (used for the FPN top-down merge)."""
    # TODO(synk): im2col still materializes the patches tensor; a fully fused
    # per-tap accumulation via Element/ds index_maps would remove that traffic.
    kh, kw, cin, cout = w.shape
    cols, (n, ho, wo) = _im2col(x, kh, kw, stride, pad)
    skip2d = None
    if skip is not None:
        skip2d = skip.reshape(n * ho * wo, cout)
    out = _pallas_matmul(cols, w.reshape(kh * kw * cin, cout), b,
                         skip=skip2d, apply_relu=relu)
    return out.reshape(n, ho, wo, cout)


def upsample2x_nearest(x):
    """NHWC nearest-neighbor 2x upsample via broadcast (fuses under jit)."""
    n, h, w, c = x.shape
    x = jnp.broadcast_to(x[:, :, None, :, None, :], (n, h, 2, w, 2, c))
    return x.reshape(n, 2 * h, 2 * w, c)


# ----------------------------------------------------------------------------
# Synthetic backbone and FPN (parameters created deterministically in-script)
# ----------------------------------------------------------------------------
def init_params(in_ch=3, chans=(8, 16, 32), fpn_ch=16):
    key = jax.random.PRNGKey(42)
    params = {}

    def normal(k, shape, scale=0.1):
        return scale * jax.random.normal(k, shape, dtype=jnp.float32)

    keys = jax.random.split(key, 32)
    ki = iter(range(32))

    # Backbone: 3 stages of 3x3 stride-2 conv + ReLU
    cins = (in_ch,) + chans[:-1]
    for s, (ci, co) in enumerate(zip(cins, chans), start=1):
        params[f"bb_w{s}"] = normal(keys[next(ki)], (3, 3, ci, co))
        params[f"bb_b{s}"] = normal(keys[next(ki)], (co,), 0.01)

    # FPN: 1x1 laterals + 3x3 output convs, one per level
    for lvl, ci in enumerate(chans, start=1):
        params[f"lat_w{lvl}"] = normal(keys[next(ki)], (1, 1, ci, fpn_ch))
        params[f"lat_b{lvl}"] = normal(keys[next(ki)], (fpn_ch,), 0.01)
        params[f"out_w{lvl}"] = normal(keys[next(ki)], (3, 3, fpn_ch, fpn_ch))
        params[f"out_b{lvl}"] = normal(keys[next(ki)], (fpn_ch,), 0.01)
    return params


def make_backbone(params):
    def backbone(x):  # x: NHWC
        f1 = conv2d(x, params["bb_w1"], params["bb_b1"], stride=2, pad=1, relu=True)
        f2 = conv2d(f1, params["bb_w2"], params["bb_b2"], stride=2, pad=1, relu=True)
        f3 = conv2d(f2, params["bb_w3"], params["bb_b3"], stride=2, pad=1, relu=True)
        return OrderedDict([("mod1", f1), ("mod2", f2), ("mod3", f3)])
    return backbone


def make_fpn(params, num_levels=3):
    def fpn(xs):  # xs: list of NHWC features, fine -> coarse
        assert len(xs) == num_levels
        merged = [None] * num_levels
        # coarsest level: plain 1x1 lateral
        merged[-1] = conv2d(xs[-1],
                            params[f"lat_w{num_levels}"],
                            params[f"lat_b{num_levels}"], stride=1, pad=0)
        # top-down pathway: lateral conv with the upsampled coarser level
        # fused into the same Pallas kernel as a skip-add
        for i in range(num_levels - 2, -1, -1):
            up = upsample2x_nearest(merged[i + 1])
            merged[i] = conv2d(xs[i],
                               params[f"lat_w{i + 1}"],
                               params[f"lat_b{i + 1}"],
                               stride=1, pad=0, skip=up)
        # 3x3 output convs
        outs = [
            conv2d(merged[i], params[f"out_w{i + 1}"], params[f"out_b{i + 1}"],
                   stride=1, pad=1)
            for i in range(num_levels)
        ]
        return outs  # fine -> coarse
    return fpn


class FPNBody:
    """JAX/Pallas equivalent of the PyTorch FPNBody wrapper."""

    def __init__(self, backbone, fpn, fpn_inputs=()):
        self.backbone = backbone
        self.fpn = fpn
        self.fpn_inputs = fpn_inputs

    def __call__(self, x_nchw):
        x = jnp.transpose(x_nchw, (0, 2, 3, 1))          # NCHW -> NHWC
        feats = self.backbone(x)
        xs = [feats[name] for name in self.fpn_inputs]
        outs = self.fpn(xs)
        return [jnp.transpose(o, (0, 3, 1, 2)) for o in outs]  # back to NCHW


# ----------------------------------------------------------------------------
if __name__ == "__main__":
    params = init_params(in_ch=3, chans=(8, 16, 32), fpn_ch=16)
    body = FPNBody(
        backbone=make_backbone(params),
        fpn=make_fpn(params, num_levels=3),
        fpn_inputs=("mod1", "mod2", "mod3"),
    )

    key = jax.random.PRNGKey(0)
    x = jax.random.normal(key, (2, 3, 16, 16), dtype=jnp.float32)  # NCHW input

    fwd = jax.jit(body.__call__)   # whole forward in one jit -> glue fuses
    outs = fwd(x)
    for o in outs:
        jax.block_until_ready(o)

    # Expected output shapes (NCHW): (2,16,8,8), (2,16,4,4), (2,16,2,2)
    expected = [(2, 16, 8, 8), (2, 16, 4, 4), (2, 16, 2, 2)]
    assert [tuple(o.shape) for o in outs] == expected, [o.shape for o in outs]
    assert all(bool(jnp.all(jnp.isfinite(o))) for o in outs)

    print("KERNEL_OK")
</pallas_src>

<mosaic_0001>
module attributes {stable_mosaic.version = 11 : i64} {
  func.func @_matmul_kernel(%arg0: i32, %arg1: i32, %arg2: memref<128x32xbf16, #tpu.memory_space<vmem>>, %arg3: memref<32x128xbf16, #tpu.memory_space<vmem>>, %arg4: memref<1x128xf32, #tpu.memory_space<vmem>>, %arg5: memref<128x128xf32, #tpu.memory_space<vmem>>, %arg6: memref<128x128xf32, #tpu.memory_space<vmem>>) attributes {dimension_semantics = [#tpu.dimension_semantics<parallel>, #tpu.dimension_semantics<arbitrary>], iteration_bounds = array<i64: 1, 1>, scalar_prefetch = 0 : i64, scratch_operands = 1 : i64, tpu.core_type = #tpu.core_type<tc>, window_params = [{transform_indices = @transform_0, window_bounds = array<i64: 128, 32>}, {transform_indices = @transform_1, window_bounds = array<i64: 32, 128>}, {pipeline_mode = #tpu.pipeline_mode<synchronous>, transform_indices = @transform_2, window_bounds = array<i64: 1, 128>}, {transform_indices = @transform_3, window_bounds = array<i64: 128, 128>}]} {
    %c0_i32 = arith.constant 0 : i32
    %0 = arith.cmpi eq, %arg1, %c0_i32 : i32
    %1 = arith.extui %0 : i1 to i32
    %c0_i32_0 = arith.constant 0 : i32
    %2 = arith.cmpi ne, %1, %c0_i32_0 : i32
    scf.if %2 {
      %cst_10 = arith.constant 0.000000e+00 : f32
      %12 = vector.broadcast %cst_10 : f32 to vector<128x128xf32>
      %c0_11 = arith.constant 0 : index
      %c0_12 = arith.constant 0 : index
      %13 = vector.load %arg6[%c0_11, %c0_12] : memref<128x128xf32, #tpu.memory_space<vmem>>, vector<128x128xf32>
      tpu.vector_store %arg6[%c0_11, %c0_12], %12 {strides = array<i32>} : memref<128x128xf32, #tpu.memory_space<vmem>>, vector<128x128xf32>,
    } else {
    }
    %c0 = arith.constant 0 : index
    %c0_1 = arith.constant 0 : index
    %3 = vector.load %arg6[%c0, %c0_1] : memref<128x128xf32, #tpu.memory_space<vmem>>, vector<128x128xf32>
    %c0_2 = arith.constant 0 : index
    %c0_3 = arith.constant 0 : index
    %4 = vector.load %arg2[%c0_2, %c0_3] : memref<128x32xbf16, #tpu.memory_space<vmem>>, vector<128x32xbf16>
    %c0_4 = arith.constant 0 : index
    %c0_5 = arith.constant 0 : index
    %5 = vector.load %arg3[%c0_4, %c0_5] : memref<32x128xbf16, #tpu.memory_space<vmem>>, vector<32x128xbf16>
    %cst = arith.constant dense<0.000000e+00> : vector<128x128xf32>
    %6 = tpu.matmul %4, %5, %cst {dimension_numbers = #tpu.dot_dimension_numbers<[1], [0], [0], [1], [0, 0, 1, 1], [], []>} : vector<128x32xbf16>, vector<32x128xbf16>, vector<128x128xf32> -> vector<128x128xf32>
    %7 = arith.addf %3, %6 : vector<128x128xf32>
    %c0_6 = arith.constant 0 : index
    %c0_7 = arith.constant 0 : index
    %8 = vector.load %arg6[%c0_6, %c0_7] : memref<128x128xf32, #tpu.memory_space<vmem>>, vector<128x128xf32>
    tpu.vector_store %arg6[%c0_6, %c0_7], %7 {strides = array<i32>} : memref<128x128xf32, #tpu.memory_space<vmem>>, vector<128x128xf32>,
    %c0_i32_8 = arith.constant 0 : i32
    %9 = arith.cmpi eq, %arg1, %c0_i32_8 : i32
    %10 = arith.extui %9 : i1 to i32
    %c0_i32_9 = arith.constant 0 : i32
    %11 = arith.cmpi ne, %10, %c0_i32_9 : i32
    scf.if %11 {
      %c0_10 = arith.constant 0 : index
      %c0_11 = arith.constant 0 : index
      %12 = vector.load %arg6[%c0_10, %c0_11] : memref<128x128xf32, #tpu.memory_space<vmem>>, vector<128x128xf32>
      %c0_12 = arith.constant 0 : index
      %c0_13 = arith.constant 0 : index
      %13 = vector.load %arg4[%c0_12, %c0_13] : memref<1x128xf32, #tpu.memory_space<vmem>>, vector<1x128xf32>
      %14 = vector.broadcast %13 : vector<1x128xf32> to vector<128x128xf32>
      %15 = arith.addf %12, %14 : vector<128x128xf32>
      %cst_14 = arith.constant 0.000000e+00 : f32
      %16 = vector.broadcast %cst_14 : f32 to vector<128x128xf32>
      %17 = arith.maximumf %15, %16 : vector<128x128xf32>
      %c0_15 = arith.constant 0 : index
      %c0_16 = arith.constant 0 : index
      %18 = vector.load %arg5[%c0_15, %c0_16] : memref<128x128xf32, #tpu.memory_space<vmem>>, vector<128x128xf32>
      tpu.vector_store %arg5[%c0_15, %c0_16], %17 {strides = array<i32>} : memref<128x128xf32, #tpu.memory_space<vmem>>, vector<128x128xf32>,
    } else {
    }
    return
  }
  func.func @transform_0(%arg0: i32, %arg1: i32) -> (i32, i32) {
    %c0_i32 = arith.constant 0 : i32
    return %arg0, %arg1 : i32, i32
  }
  func.func @transform_1(%arg0: i32, %arg1: i32) -> (i32, i32) {
    %c0_i32 = arith.constant 0 : i32
    %c0_i32_0 = arith.constant 0 : i32
    return %arg1, %c0_i32 : i32, i32
  }
  func.func @transform_2(%arg0: i32, %arg1: i32) -> (i32, i32) {
    %c0_i32 = arith.constant 0 : i32
    %c0_i32_0 = arith.constant 0 : i32
    %c0_i32_1 = arith.constant 0 : i32
    return %c0_i32, %c0_i32_0 : i32, i32
  }
  func.func @transform_3(%arg0: i32, %arg1: i32) -> (i32, i32) {
    %c0_i32 = arith.constant 0 : i32
    %c0_i32_0 = arith.constant 0 : i32
    return %arg0, %c0_i32 : i32, i32
  }
}

module attributes {stable_mosaic.version = 11 : i64} {
  func.func @_matmul_kernel(%arg0: i32, %arg1: i32, %arg2: memref<32x80xbf16, #tpu.memory_space<vmem>>, %arg3: memref<80x128xbf16, #tpu.memory_space<vmem>>, %arg4: memref<1x128xf32, #tpu.memory_space<vmem>>, %arg5: memref<32x128xf32, #tpu.memory_space<vmem>>, %arg6: memref<32x128xf32, #tpu.memory_space<vmem>>) attributes {dimension_semantics = [#tpu.dimension_semantics<parallel>, #tpu.dimension_semantics<arbitrary>], iteration_bounds = array<i64: 1, 1>, scalar_prefetch = 0 : i64, scratch_operands = 1 : i64, tpu.core_type = #tpu.core_type<tc>, window_params = [{transform_indices = @transform_0, window_bounds = array<i64: 32, 80>}, {transform_indices = @transform_1, window_bounds = array<i64: 80, 128>}, {pipeline_mode = #tpu.pipeline_mode<synchronous>, transform_indices = @transform_2, window_bounds = array<i64: 1, 128>}, {transform_indices = @transform_3, window_bounds = array<i64: 32, 128>}]} {
    %c0_i32 = arith.constant 0 : i32
    %0 = arith.cmpi eq, %arg1, %c0_i32 : i32
    %1 = arith.extui %0 : i1 to i32
    %c0_i32_0 = arith.constant 0 : i32
    %2 = arith.cmpi ne, %1, %c0_i32_0 : i32
    scf.if %2 {
      %cst_10 = arith.constant 0.000000e+00 : f32
      %12 = vector.broadcast %cst_10 : f32 to vector<32x128xf32>
      %c0_11 = arith.constant 0 : index
      %c0_12 = arith.constant 0 : index
      %13 = vector.load %arg6[%c0_11, %c0_12] : memref<32x128xf32, #tpu.memory_space<vmem>>, vector<32x128xf32>
      tpu.vector_store %arg6[%c0_11, %c0_12], %12 {strides = array<i32>} : memref<32x128xf32, #tpu.memory_space<vmem>>, vector<32x128xf32>,
    } else {
    }
    %c0 = arith.constant 0 : index
    %c0_1 = arith.constant 0 : index
    %3 = vector.load %arg6[%c0, %c0_1] : memref<32x128xf32, #tpu.memory_space<vmem>>, vector<32x128xf32>
    %c0_2 = arith.constant 0 : index
    %c0_3 = arith.constant 0 : index
    %4 = vector.load %arg2[%c0_2, %c0_3] : memref<32x80xbf16, #tpu.memory_space<vmem>>, vector<32x80xbf16>
    %c0_4 = arith.constant 0 : index
    %c0_5 = arith.constant 0 : index
    %5 = vector.load %arg3[%c0_4, %c0_5] : memref<80x128xbf16, #tpu.memory_space<vmem>>, vector<80x128xbf16>
    %cst = arith.constant dense<0.000000e+00> : vector<32x128xf32>
    %6 = tpu.matmul %4, %5, %cst {dimension_numbers = #tpu.dot_dimension_numbers<[1], [0], [0], [1], [0, 0, 1, 1], [], []>} : vector<32x80xbf16>, vector<80x128xbf16>, vector<32x128xf32> -> vector<32x128xf32>
    %7 = arith.addf %3, %6 : vector<32x128xf32>
    %c0_6 = arith.constant 0 : index
    %c0_7 = arith.constant 0 : index
    %8 = vector.load %arg6[%c0_6, %c0_7] : memref<32x128xf32, #tpu.memory_space<vmem>>, vector<32x128xf32>
    tpu.vector_store %arg6[%c0_6, %c0_7], %7 {strides = array<i32>} : memref<32x128xf32, #tpu.memory_space<vmem>>, vector<32x128xf32>,
    %c0_i32_8 = arith.constant 0 : i32
    %9 = arith.cmpi eq, %arg1, %c0_i32_8 : i32
    %10 = arith.extui %9 : i1 to i32
    %c0_i32_9 = arith.constant 0 : i32
    %11 = arith.cmpi ne, %10, %c0_i32_9 : i32
    scf.if %11 {
      %c0_10 = arith.constant 0 : index
      %c0_11 = arith.constant 0 : index
      %12 = vector.load %arg6[%c0_10, %c0_11] : memref<32x128xf32, #tpu.memory_space<vmem>>, vector<32x128xf32>
      %c0_12 = arith.constant 0 : index
      %c0_13 = arith.constant 0 : index
      %13 = vector.load %arg4[%c0_12, %c0_13] : memref<1x128xf32, #tpu.memory_space<vmem>>, vector<1x128xf32>
      %14 = vector.broadcast %13 : vector<1x128xf32> to vector<32x128xf32>
      %15 = arith.addf %12, %14 : vector<32x128xf32>
      %cst_14 = arith.constant 0.000000e+00 : f32
      %16 = vector.broadcast %cst_14 : f32 to vector<32x128xf32>
      %17 = arith.maximumf %15, %16 : vector<32x128xf32>
      %c0_15 = arith.constant 0 : index
      %c0_16 = arith.constant 0 : index
      %18 = vector.load %arg5[%c0_15, %c0_16] : memref<32x128xf32, #tpu.memory_space<vmem>>, vector<32x128xf32>
      tpu.vector_store %arg5[%c0_15, %c0_16], %17 {strides = array<i32>} : memref<32x128xf32, #tpu.memory_space<vmem>>, vector<32x128xf32>,
    } else {
    }
    return
  }
  func.func @transform_0(%arg0: i32, %arg1: i32) -> (i32, i32) {
    %c0_i32 = arith.constant 0 : i32
    return %arg0, %arg1 : i32, i32
  }
  func.func @transform_1(%arg0: i32, %arg1: i32) -> (i32, i32) {
    %c0_i32 = arith.constant 0 : i32
    %c0_i32_0 = arith.constant 0 : i32
    return %arg1, %c0_i32 : i32, i32
  }
  func.func @transform_2(%arg0: i32, %arg1: i32) -> (i32, i32) {
    %c0_i32 = arith.constant 0 : i32
    %c0_i32_0 = arith.constant 0 : i32
    %c0_i32_1 = arith.constant 0 : i32
    return %c0_i32, %c0_i32_0 : i32, i32
  }
  func.func @transform_3(%arg0: i32, %arg1: i32) -> (i32, i32) {
    %c0_i32 = arith.constant 0 : i32
    %c0_i32_0 = arith.constant 0 : i32
    return %arg0, %c0_i32 : i32, i32
  }
}

module attributes {stable_mosaic.version = 11 : i64} {
  func.func @_matmul_kernel(%arg0: i32, %arg1: i32, %arg2: memref<16x32xbf16, #tpu.memory_space<vmem>>, %arg3: memref<32x128xbf16, #tpu.memory_space<vmem>>, %arg4: memref<1x128xf32, #tpu.memory_space<vmem>>, %arg5: memref<16x128xf32, #tpu.memory_space<vmem>>, %arg6: memref<16x128xf32, #tpu.memory_space<vmem>>) attributes {dimension_semantics = [#tpu.dimension_semantics<parallel>, #tpu.dimension_semantics<arbitrary>], iteration_bounds = array<i64: 1, 1>, scalar_prefetch = 0 : i64, scratch_operands = 1 : i64, tpu.core_type = #tpu.core_type<tc>, window_params = [{transform_indices = @transform_0, window_bounds = array<i64: 16, 32>}, {transform_indices = @transform_1, window_bounds = array<i64: 32, 128>}, {pipeline_mode = #tpu.pipeline_mode<synchronous>, transform_indices = @transform_2, window_bounds = array<i64: 1, 128>}, {transform_indices = @transform_3, window_bounds = array<i64: 16, 128>}]} {
    %c0_i32 = arith.constant 0 : i32
    %0 = arith.cmpi eq, %arg1, %c0_i32 : i32
    %1 = arith.extui %0 : i1 to i32
    %c0_i32_0 = arith.constant 0 : i32
    %2 = arith.cmpi ne, %1, %c0_i32_0 : i32
    scf.if %2 {
      %cst_10 = arith.constant 0.000000e+00 : f32
      %12 = vector.broadcast %cst_10 : f32 to vector<16x128xf32>
      %c0_11 = arith.constant 0 : index
      %c0_12 = arith.constant 0 : index
      %13 = vector.load %arg6[%c0_11, %c0_12] : memref<16x128xf32, #tpu.memory_space<vmem>>, vector<16x128xf32>
      tpu.vector_store %arg6[%c0_11, %c0_12], %12 {strides = array<i32>} : memref<16x128xf32, #tpu.memory_space<vmem>>, vector<16x128xf32>,
    } else {
    }
    %c0 = arith.constant 0 : index
    %c0_1 = arith.constant 0 : index
    %3 = vector.load %arg6[%c0, %c0_1] : memref<16x128xf32, #tpu.memory_space<vmem>>, vector<16x128xf32>
    %c0_2 = arith.constant 0 : index
    %c0_3 = arith.constant 0 : index
    %4 = vector.load %arg2[%c0_2, %c0_3] : memref<16x32xbf16, #tpu.memory_space<vmem>>, vector<16x32xbf16>
    %c0_4 = arith.constant 0 : index
    %c0_5 = arith.constant 0 : index
    %5 = vector.load %arg3[%c0_4, %c0_5] : memref<32x128xbf16, #tpu.memory_space<vmem>>, vector<32x128xbf16>
    %cst = arith.constant dense<0.000000e+00> : vector<16x128xf32>
    %6 = tpu.matmul %4, %5, %cst {dimension_numbers = #tpu.dot_dimension_numbers<[1], [0], [0], [1], [0, 0, 1, 1], [], []>} : vector<16x32xbf16>, vector<32x128xbf16>, vector<16x128xf32> -> vector<16x128xf32>
    %7 = arith.addf %3, %6 : vector<16x128xf32>
    %c0_6 = arith.constant 0 : index
    %c0_7 = arith.constant 0 : index
    %8 = vector.load %arg6[%c0_6, %c0_7] : memref<16x128xf32, #tpu.memory_space<vmem>>, vector<16x128xf32>
    tpu.vector_store %arg6[%c0_6, %c0_7], %7 {strides = array<i32>} : memref<16x128xf32, #tpu.memory_space<vmem>>, vector<16x128xf32>,
    %c0_i32_8 = arith.constant 0 : i32
    %9 = arith.cmpi eq, %arg1, %c0_i32_8 : i32
    %10 = arith.extui %9 : i1 to i32
    %c0_i32_9 = arith.constant 0 : i32
    %11 = arith.cmpi ne, %10, %c0_i32_9 : i32
    scf.if %11 {
      %c0_10 = arith.constant 0 : index
      %c0_11 = arith.constant 0 : index
      %12 = vector.load %arg6[%c0_10, %c0_11] : memref<16x128xf32, #tpu.memory_space<vmem>>, vector<16x128xf32>
      %c0_12 = arith.constant 0 : index
      %c0_13 = arith.constant 0 : index
      %13 = vector.load %arg4[%c0_12, %c0_13] : memref<1x128xf32, #tpu.memory_space<vmem>>, vector<1x128xf32>
      %14 = vector.broadcast %13 : vector<1x128xf32> to vector<16x128xf32>
      %15 = arith.addf %12, %14 : vector<16x128xf32>
      %c0_14 = arith.constant 0 : index
      %c0_15 = arith.constant 0 : index
      %16 = vector.load %arg5[%c0_14, %c0_15] : memref<16x128xf32, #tpu.memory_space<vmem>>, vector<16x128xf32>
      tpu.vector_store %arg5[%c0_14, %c0_15], %15 {strides = array<i32>} : memref<16x128xf32, #tpu.memory_space<vmem>>, vector<16x128xf32>,
    } else {
    }
    return
  }
  func.func @transform_0(%arg0: i32, %arg1: i32) -> (i32, i32) {
    %c0_i32 = arith.constant 0 : i32
    return %arg0, %arg1 : i32, i32
  }
  func.func @transform_1(%arg0: i32, %arg1: i32) -> (i32, i32) {
    %c0_i32 = arith.constant 0 : i32
    %c0_i32_0 = arith.constant 0 : i32
    return %arg1, %c0_i32 : i32, i32
  }
  func.func @transform_2(%arg0: i32, %arg1: i32) -> (i32, i32) {
    %c0_i32 = arith.constant 0 : i32
    %c0_i32_0 = arith.constant 0 : i32
    %c0_i32_1 = arith.constant 0 : i32
    return %c0_i32, %c0_i32_0 : i32, i32
  }
  func.func @transform_3(%arg0: i32, %arg1: i32) -> (i32, i32) {
    %c0_i32 = arith.constant 0 : i32
    %c0_i32_0 = arith.constant 0 : i32
    return %arg0, %c0_i32 : i32, i32
  }
}

module attributes {stable_mosaic.version = 11 : i64} {
  func.func @_matmul_kernel(%arg0: i32, %arg1: i32, %arg2: memref<16x144xbf16, #tpu.memory_space<vmem>>, %arg3: memref<144x128xbf16, #tpu.memory_space<vmem>>, %arg4: memref<1x128xf32, #tpu.memory_space<vmem>>, %arg5: memref<16x128xf32, #tpu.memory_space<vmem>>, %arg6: memref<16x128xf32, #tpu.memory_space<vmem>>) attributes {dimension_semantics = [#tpu.dimension_semantics<parallel>, #tpu.dimension_semantics<arbitrary>], iteration_bounds = array<i64: 1, 1>, scalar_prefetch = 0 : i64, scratch_operands = 1 : i64, tpu.core_type = #tpu.core_type<tc>, window_params = [{transform_indices = @transform_0, window_bounds = array<i64: 16, 144>}, {transform_indices = @transform_1, window_bounds = array<i64: 144, 128>}, {pipeline_mode = #tpu.pipeline_mode<synchronous>, transform_indices = @transform_2, window_bounds = array<i64: 1, 128>}, {transform_indices = @transform_3, window_bounds = array<i64: 16, 128>}]} {
    %c0_i32 = arith.constant 0 : i32
    %0 = arith.cmpi eq, %arg1, %c0_i32 : i32
    %1 = arith.extui %0 : i1 to i32
    %c0_i32_0 = arith.constant 0 : i32
    %2 = arith.cmpi ne, %1, %c0_i32_0 : i32
    scf.if %2 {
      %cst_10 = arith.constant 0.000000e+00 : f32
      %12 = vector.broadcast %cst_10 : f32 to vector<16x128xf32>
      %c0_11 = arith.constant 0 : index
      %c0_12 = arith.constant 0 : index
      %13 = vector.load %arg6[%c0_11, %c0_12] : memref<16x128xf32, #tpu.memory_space<vmem>>, vector<16x128xf32>
      tpu.vector_store %arg6[%c0_11, %c0_12], %12 {strides = array<i32>} : memref<16x128xf32, #tpu.memory_space<vmem>>, vector<16x128xf32>,
    } else {
    }
    %c0 = arith.constant 0 : index
    %c0_1 = arith.constant 0 : index
    %3 = vector.load %arg6[%c0, %c0_1] : memref<16x128xf32, #tpu.memory_space<vmem>>, vector<16x128xf32>
    %c0_2 = arith.constant 0 : index
    %c0_3 = arith.constant 0 : index
    %4 = vector.load %arg2[%c0_2, %c0_3] : memref<16x144xbf16, #tpu.memory_space<vmem>>, vector<16x144xbf16>
    %c0_4 = arith.constant 0 : index
    %c0_5 = arith.constant 0 : index
    %5 = vector.load %arg3[%c0_4, %c0_5] : memref<144x128xbf16, #tpu.memory_space<vmem>>, vector<144x128xbf16>
    %cst = arith.constant dense<0.000000e+00> : vector<16x128xf32>
    %6 = tpu.matmul %4, %5, %cst {dimension_numbers = #tpu.dot_dimension_numbers<[1], [0], [0], [1], [0, 0, 1, 1], [], []>} : vector<16x144xbf16>, vector<144x128xbf16>, vector<16x128xf32> -> vector<16x128xf32>
    %7 = arith.addf %3, %6 : vector<16x128xf32>
    %c0_6 = arith.constant 0 : index
    %c0_7 = arith.constant 0 : index
    %8 = vector.load %arg6[%c0_6, %c0_7] : memref<16x128xf32, #tpu.memory_space<vmem>>, vector<16x128xf32>
    tpu.vector_store %arg6[%c0_6, %c0_7], %7 {strides = array<i32>} : memref<16x128xf32, #tpu.memory_space<vmem>>, vector<16x128xf32>,
    %c0_i32_8 = arith.constant 0 : i32
    %9 = arith.cmpi eq, %arg1, %c0_i32_8 : i32
    %10 = arith.extui %9 : i1 to i32
    %c0_i32_9 = arith.constant 0 : i32
    %11 = arith.cmpi ne, %10, %c0_i32_9 : i32
    scf.if %11 {
      %c0_10 = arith.constant 0 : index
      %c0_11 = arith.constant 0 : index
      %12 = vector.load %arg6[%c0_10, %c0_11] : memref<16x128xf32, #tpu.memory_space<vmem>>, vector<16x128xf32>
      %c0_12 = arith.constant 0 : index
      %c0_13 = arith.constant 0 : index
      %13 = vector.load %arg4[%c0_12, %c0_13] : memref<1x128xf32, #tpu.memory_space<vmem>>, vector<1x128xf32>
      %14 = vector.broadcast %13 : vector<1x128xf32> to vector<16x128xf32>
      %15 = arith.addf %12, %14 : vector<16x128xf32>
      %cst_14 = arith.constant 0.000000e+00 : f32
      %16 = vector.broadcast %cst_14 : f32 to vector<16x128xf32>
      %17 = arith.maximumf %15, %16 : vector<16x128xf32>
      %c0_15 = arith.constant 0 : index
      %c0_16 = arith.constant 0 : index
      %18 = vector.load %arg5[%c0_15, %c0_16] : memref<16x128xf32, #tpu.memory_space<vmem>>, vector<16x128xf32>
      tpu.vector_store %arg5[%c0_15, %c0_16], %17 {strides = array<i32>} : memref<16x128xf32, #tpu.memory_space<vmem>>, vector<16x128xf32>,
    } else {
    }
    return
  }
  func.func @transform_0(%arg0: i32, %arg1: i32) -> (i32, i32) {
    %c0_i32 = arith.constant 0 : i32
    return %arg0, %arg1 : i32, i32
  }
  func.func @transform_1(%arg0: i32, %arg1: i32) -> (i32, i32) {
    %c0_i32 = arith.constant 0 : i32
    %c0_i32_0 = arith.constant 0 : i32
    return %arg1, %c0_i32 : i32, i32
  }
  func.func @transform_2(%arg0: i32, %arg1: i32) -> (i32, i32) {
    %c0_i32 = arith.constant 0 : i32
    %c0_i32_0 = arith.constant 0 : i32
    %c0_i32_1 = arith.constant 0 : i32
    return %c0_i32, %c0_i32_0 : i32, i32
  }
  func.func @transform_3(%arg0: i32, %arg1: i32) -> (i32, i32) {
    %c0_i32 = arith.constant 0 : i32
    %c0_i32_0 = arith.constant 0 : i32
    return %arg0, %c0_i32 : i32, i32
  }
}

module attributes {stable_mosaic.version = 11 : i64} {
  func.func @_matmul_kernel(%arg0: i32, %arg1: i32, %arg2: memref<16x144xbf16, #tpu.memory_space<vmem>>, %arg3: memref<144x128xbf16, #tpu.memory_space<vmem>>, %arg4: memref<1x128xf32, #tpu.memory_space<vmem>>, %arg5: memref<16x128xf32, #tpu.memory_space<vmem>>, %arg6: memref<16x128xf32, #tpu.memory_space<vmem>>) attributes {dimension_semantics = [#tpu.dimension_semantics<parallel>, #tpu.dimension_semantics<arbitrary>], iteration_bounds = array<i64: 1, 1>, scalar_prefetch = 0 : i64, scratch_operands = 1 : i64, tpu.core_type = #tpu.core_type<tc>, window_params = [{transform_indices = @transform_0, window_bounds = array<i64: 16, 144>}, {transform_indices = @transform_1, window_bounds = array<i64: 144, 128>}, {pipeline_mode = #tpu.pipeline_mode<synchronous>, transform_indices = @transform_2, window_bounds = array<i64: 1, 128>}, {transform_indices = @transform_3, window_bounds = array<i64: 16, 128>}]} {
    %c0_i32 = arith.constant 0 : i32
    %0 = arith.cmpi eq, %arg1, %c0_i32 : i32
    %1 = arith.extui %0 : i1 to i32
    %c0_i32_0 = arith.constant 0 : i32
    %2 = arith.cmpi ne, %1, %c0_i32_0 : i32
    scf.if %2 {
      %cst_10 = arith.constant 0.000000e+00 : f32
      %12 = vector.broadcast %cst_10 : f32 to vector<16x128xf32>
      %c0_11 = arith.constant 0 : index
      %c0_12 = arith.constant 0 : index
      %13 = vector.load %arg6[%c0_11, %c0_12] : memref<16x128xf32, #tpu.memory_space<vmem>>, vector<16x128xf32>
      tpu.vector_store %arg6[%c0_11, %c0_12], %12 {strides = array<i32>} : memref<16x128xf32, #tpu.memory_space<vmem>>, vector<16x128xf32>,
    } else {
    }
    %c0 = arith.constant 0 : index
    %c0_1 = arith.constant 0 : index
    %3 = vector.load %arg6[%c0, %c0_1] : memref<16x128xf32, #tpu.memory_space<vmem>>, vector<16x128xf32>
    %c0_2 = arith.constant 0 : index
    %c0_3 = arith.constant 0 : index
    %4 = vector.load %arg2[%c0_2, %c0_3] : memref<16x144xbf16, #tpu.memory_space<vmem>>, vector<16x144xbf16>
    %c0_4 = arith.constant 0 : index
    %c0_5 = arith.constant 0 : index
    %5 = vector.load %arg3[%c0_4, %c0_5] : memref<144x128xbf16, #tpu.memory_space<vmem>>, vector<144x128xbf16>
    %cst = arith.constant dense<0.000000e+00> : vector<16x128xf32>
    %6 = tpu.matmul %4, %5, %cst {dimension_numbers = #tpu.dot_dimension_numbers<[1], [0], [0], [1], [0, 0, 1, 1], [], []>} : vector<16x144xbf16>, vector<144x128xbf16>, vector<16x128xf32> -> vector<16x128xf32>
    %7 = arith.addf %3, %6 : vector<16x128xf32>
    %c0_6 = arith.constant 0 : index
    %c0_7 = arith.constant 0 : index
    %8 = vector.load %arg6[%c0_6, %c0_7] : memref<16x128xf32, #tpu.memory_space<vmem>>, vector<16x128xf32>
    tpu.vector_store %arg6[%c0_6, %c0_7], %7 {strides = array<i32>} : memref<16x128xf32, #tpu.memory_space<vmem>>, vector<16x128xf32>,
    %c0_i32_8 = arith.constant 0 : i32
    %9 = arith.cmpi eq, %arg1, %c0_i32_8 : i32
    %10 = arith.extui %9 : i1 to i32
    %c0_i32_9 = arith.constant 0 : i32
    %11 = arith.cmpi ne, %10, %c0_i32_9 : i32
    scf.if %11 {
      %c0_10 = arith.constant 0 : index
      %c0_11 = arith.constant 0 : index
      %12 = vector.load %arg6[%c0_10, %c0_11] : memref<16x128xf32, #tpu.memory_space<vmem>>, vector<16x128xf32>
      %c0_12 = arith.constant 0 : index
      %c0_13 = arith.constant 0 : index
      %13 = vector.load %arg4[%c0_12, %c0_13] : memref<1x128xf32, #tpu.memory_space<vmem>>, vector<1x128xf32>
      %14 = vector.broadcast %13 : vector<1x128xf32> to vector<16x128xf32>
      %15 = arith.addf %12, %14 : vector<16x128xf32>
      %c0_14 = arith.constant 0 : index
      %c0_15 = arith.constant 0 : index
      %16 = vector.load %arg5[%c0_14, %c0_15] : memref<16x128xf32, #tpu.memory_space<vmem>>, vector<16x128xf32>
      tpu.vector_store %arg5[%c0_14, %c0_15], %15 {strides = array<i32>} : memref<16x128xf32, #tpu.memory_space<vmem>>, vector<16x128xf32>,
    } else {
    }
    return
  }
  func.func @transform_0(%arg0: i32, %arg1: i32) -> (i32, i32) {
    %c0_i32 = arith.constant 0 : i32
    return %arg0, %arg1 : i32, i32
  }
  func.func @transform_1(%arg0: i32, %arg1: i32) -> (i32, i32) {
    %c0_i32 = arith.constant 0 : i32
    %c0_i32_0 = arith.constant 0 : i32
    return %arg1, %c0_i32 : i32, i32
  }
  func.func @transform_2(%arg0: i32, %arg1: i32) -> (i32, i32) {
    %c0_i32 = arith.constant 0 : i32
    %c0_i32_0 = arith.constant 0 : i32
    %c0_i32_1 = arith.constant 0 : i32
    return %c0_i32, %c0_i32_0 : i32, i32
  }
  func.func @transform_3(%arg0: i32, %arg1: i32) -> (i32, i32) {
    %c0_i32 = arith.constant 0 : i32
    %c0_i32_0 = arith.constant 0 : i32
    return %arg0, %c0_i32 : i32, i32
  }
}

module attributes {stable_mosaic.version = 11 : i64} {
  func.func @_matmul_kernel(%arg0: i32, %arg1: i32, %arg2: memref<32x16xbf16, #tpu.memory_space<vmem>>, %arg3: memref<16x128xbf16, #tpu.memory_space<vmem>>, %arg4: memref<1x128xf32, #tpu.memory_space<vmem>>, %arg5: memref<32x128xf32, #tpu.memory_space<vmem>>, %arg6: memref<32x128xf32, #tpu.memory_space<vmem>>, %arg7: memref<32x128xf32, #tpu.memory_space<vmem>>) attributes {dimension_semantics = [#tpu.dimension_semantics<parallel>, #tpu.dimension_semantics<arbitrary>], iteration_bounds = array<i64: 1, 1>, scalar_prefetch = 0 : i64, scratch_operands = 1 : i64, tpu.core_type = #tpu.core_type<tc>, window_params = [{transform_indices = @transform_0, window_bounds = array<i64: 32, 16>}, {transform_indices = @transform_1, window_bounds = array<i64: 16, 128>}, {pipeline_mode = #tpu.pipeline_mode<synchronous>, transform_indices = @transform_2, window_bounds = array<i64: 1, 128>}, {transform_indices = @transform_3, window_bounds = array<i64: 32, 128>}, {transform_indices = @transform_4, window_bounds = array<i64: 32, 128>}]} {
    %c0_i32 = arith.constant 0 : i32
    %0 = arith.cmpi eq, %arg1, %c0_i32 : i32
    %1 = arith.extui %0 : i1 to i32
    %c0_i32_0 = arith.constant 0 : i32
    %2 = arith.cmpi ne, %1, %c0_i32_0 : i32
    scf.if %2 {
      %cst_10 = arith.constant 0.000000e+00 : f32
      %12 = vector.broadcast %cst_10 : f32 to vector<32x128xf32>
      %c0_11 = arith.constant 0 : index
      %c0_12 = arith.constant 0 : index
      %13 = vector.load %arg7[%c0_11, %c0_12] : memref<32x128xf32, #tpu.memory_space<vmem>>, vector<32x128xf32>
      tpu.vector_store %arg7[%c0_11, %c0_12], %12 {strides = array<i32>} : memref<32x128xf32, #tpu.memory_space<vmem>>, vector<32x128xf32>,
    } else {
    }
    %c0 = arith.constant 0 : index
    %c0_1 = arith.constant 0 : index
    %3 = vector.load %arg7[%c0, %c0_1] : memref<32x128xf32, #tpu.memory_space<vmem>>, vector<32x128xf32>
    %c0_2 = arith.constant 0 : index
    %c0_3 = arith.constant 0 : index
    %4 = vector.load %arg2[%c0_2, %c0_3] : memref<32x16xbf16, #tpu.memory_space<vmem>>, vector<32x16xbf16>
    %c0_4 = arith.constant 0 : index
    %c0_5 = arith.constant 0 : index
    %5 = vector.load %arg3[%c0_4, %c0_5] : memref<16x128xbf16, #tpu.memory_space<vmem>>, vector<16x128xbf16>
    %cst = arith.constant dense<0.000000e+00> : vector<32x128xf32>
    %6 = tpu.matmul %4, %5, %cst {dimension_numbers = #tpu.dot_dimension_numbers<[1], [0], [0], [1], [0, 0, 1, 1], [], []>} : vector<32x16xbf16>, vector<16x128xbf16>, vector<32x128xf32> -> vector<32x128xf32>
    %7 = arith.addf %3, %6 : vector<32x128xf32>
    %c0_6 = arith.constant 0 : index
    %c0_7 = arith.constant 0 : index
    %8 = vector.load %arg7[%c0_6, %c0_7] : memref<32x128xf32, #tpu.memory_space<vmem>>, vector<32x128xf32>
    tpu.vector_store %arg7[%c0_6, %c0_7], %7 {strides = array<i32>} : memref<32x128xf32, #tpu.memory_space<vmem>>, vector<32x128xf32>,
    %c0_i32_8 = arith.constant 0 : i32
    %9 = arith.cmpi eq, %arg1, %c0_i32_8 : i32
    %10 = arith.extui %9 : i1 to i32
    %c0_i32_9 = arith.constant 0 : i32
    %11 = arith.cmpi ne, %10, %c0_i32_9 : i32
    scf.if %11 {
      %c0_10 = arith.constant 0 : index
      %c0_11 = arith.constant 0 : index
      %12 = vector.load %arg7[%c0_10, %c0_11] : memref<32x128xf32, #tpu.memory_space<vmem>>, vector<32x128xf32>
      %c0_12 = arith.constant 0 : index
      %c0_13 = arith.constant 0 : index
      %13 = vector.load %arg4[%c0_12, %c0_13] : memref<1x128xf32, #tpu.memory_space<vmem>>, vector<1x128xf32>
      %14 = vector.broadcast %13 : vector<1x128xf32> to vector<32x128xf32>
      %15 = arith.addf %12, %14 : vector<32x128xf32>
      %c0_14 = arith.constant 0 : index
      %c0_15 = arith.constant 0 : index
      %16 = vector.load %arg5[%c0_14, %c0_15] : memref<32x128xf32, #tpu.memory_space<vmem>>, vector<32x128xf32>
      %17 = arith.addf %15, %16 : vector<32x128xf32>
      %c0_16 = arith.constant 0 : index
      %c0_17 = arith.constant 0 : index
      %18 = vector.load %arg6[%c0_16, %c0_17] : memref<32x128xf32, #tpu.memory_space<vmem>>, vector<32x128xf32>
      tpu.vector_store %arg6[%c0_16, %c0_17], %17 {strides = array<i32>} : memref<32x128xf32, #tpu.memory_space<vmem>>, vector<32x128xf32>,
    } else {
    }
    return
  }
  func.func @transform_0(%arg0: i32, %arg1: i32) -> (i32, i32) {
    %c0_i32 = arith.constant 0 : i32
    return %arg0, %arg1 : i32, i32
  }
  func.func @transform_1(%arg0: i32, %arg1: i32) -> (i32, i32) {
    %c0_i32 = arith.constant 0 : i32
    %c0_i32_0 = arith.constant 0 : i32
    return %arg1, %c0_i32 : i32, i32
  }
  func.func @transform_2(%arg0: i32, %arg1: i32) -> (i32, i32) {
    %c0_i32 = arith.constant 0 : i32
    %c0_i32_0 = arith.constant 0 : i32
    %c0_i32_1 = arith.constant 0 : i32
    return %c0_i32, %c0_i32_0 : i32, i32
  }
  func.func @transform_3(%arg0: i32, %arg1: i32) -> (i32, i32) {
    %c0_i32 = arith.constant 0 : i32
    %c0_i32_0 = arith.constant 0 : i32
    return %arg0, %c0_i32 : i32, i32
  }
  func.func @transform_4(%arg0: i32, %arg1: i32) -> (i32, i32) {
    %c0_i32 = arith.constant 0 : i32
    %c0_i32_0 = arith.constant 0 : i32
    return %arg0, %c0_i32 : i32, i32
  }
}

module attributes {stable_mosaic.version = 11 : i64} {
  func.func @_matmul_kernel(%arg0: i32, %arg1: i32, %arg2: memref<32x144xbf16, #tpu.memory_space<vmem>>, %arg3: memref<144x128xbf16, #tpu.memory_space<vmem>>, %arg4: memref<1x128xf32, #tpu.memory_space<vmem>>, %arg5: memref<32x128xf32, #tpu.memory_space<vmem>>, %arg6: memref<32x128xf32, #tpu.memory_space<vmem>>) attributes {dimension_semantics = [#tpu.dimension_semantics<parallel>, #tpu.dimension_semantics<arbitrary>], iteration_bounds = array<i64: 1, 1>, scalar_prefetch = 0 : i64, scratch_operands = 1 : i64, tpu.core_type = #tpu.core_type<tc>, window_params = [{transform_indices = @transform_0, window_bounds = array<i64: 32, 144>}, {transform_indices = @transform_1, window_bounds = array<i64: 144, 128>}, {pipeline_mode = #tpu.pipeline_mode<synchronous>, transform_indices = @transform_2, window_bounds = array<i64: 1, 128>}, {transform_indices = @transform_3, window_bounds = array<i64: 32, 128>}]} {
    %c0_i32 = arith.constant 0 : i32
    %0 = arith.cmpi eq, %arg1, %c0_i32 : i32
    %1 = arith.extui %0 : i1 to i32
    %c0_i32_0 = arith.constant 0 : i32
    %2 = arith.cmpi ne, %1, %c0_i32_0 : i32
    scf.if %2 {
      %cst_10 = arith.constant 0.000000e+00 : f32
      %12 = vector.broadcast %cst_10 : f32 to vector<32x128xf32>
      %c0_11 = arith.constant 0 : index
      %c0_12 = arith.constant 0 : index
      %13 = vector.load %arg6[%c0_11, %c0_12] : memref<32x128xf32, #tpu.memory_space<vmem>>, vector<32x128xf32>
      tpu.vector_store %arg6[%c0_11, %c0_12], %12 {strides = array<i32>} : memref<32x128xf32, #tpu.memory_space<vmem>>, vector<32x128xf32>,
    } else {
    }
    %c0 = arith.constant 0 : index
    %c0_1 = arith.constant 0 : index
    %3 = vector.load %arg6[%c0, %c0_1] : memref<32x128xf32, #tpu.memory_space<vmem>>, vector<32x128xf32>
    %c0_2 = arith.constant 0 : index
    %c0_3 = arith.constant 0 : index
    %4 = vector.load %arg2[%c0_2, %c0_3] : memref<32x144xbf16, #tpu.memory_space<vmem>>, vector<32x144xbf16>
    %c0_4 = arith.constant 0 : index
    %c0_5 = arith.constant 0 : index
    %5 = vector.load %arg3[%c0_4, %c0_5] : memref<144x128xbf16, #tpu.memory_space<vmem>>, vector<144x128xbf16>
    %cst = arith.constant dense<0.000000e+00> : vector<32x128xf32>
    %6 = tpu.matmul %4, %5, %cst {dimension_numbers = #tpu.dot_dimension_numbers<[1], [0], [0], [1], [0, 0, 1, 1], [], []>} : vector<32x144xbf16>, vector<144x128xbf16>, vector<32x128xf32> -> vector<32x128xf32>
    %7 = arith.addf %3, %6 : vector<32x128xf32>
    %c0_6 = arith.constant 0 : index
    %c0_7 = arith.constant 0 : index
    %8 = vector.load %arg6[%c0_6, %c0_7] : memref<32x128xf32, #tpu.memory_space<vmem>>, vector<32x128xf32>
    tpu.vector_store %arg6[%c0_6, %c0_7], %7 {strides = array<i32>} : memref<32x128xf32, #tpu.memory_space<vmem>>, vector<32x128xf32>,
    %c0_i32_8 = arith.constant 0 : i32
    %9 = arith.cmpi eq, %arg1, %c0_i32_8 : i32
    %10 = arith.extui %9 : i1 to i32
    %c0_i32_9 = arith.constant 0 : i32
    %11 = arith.cmpi ne, %10, %c0_i32_9 : i32
    scf.if %11 {
      %c0_10 = arith.constant 0 : index
      %c0_11 = arith.constant 0 : index
      %12 = vector.load %arg6[%c0_10, %c0_11] : memref<32x128xf32, #tpu.memory_space<vmem>>, vector<32x128xf32>
      %c0_12 = arith.constant 0 : index
      %c0_13 = arith.constant 0 : index
      %13 = vector.load %arg4[%c0_12, %c0_13] : memref<1x128xf32, #tpu.memory_space<vmem>>, vector<1x128xf32>
      %14 = vector.broadcast %13 : vector<1x128xf32> to vector<32x128xf32>
      %15 = arith.addf %12, %14 : vector<32x128xf32>
      %c0_14 = arith.constant 0 : index
      %c0_15 = arith.constant 0 : index
      %16 = vector.load %arg5[%c0_14, %c0_15] : memref<32x128xf32, #tpu.memory_space<vmem>>, vector<32x128xf32>
      tpu.vector_store %arg5[%c0_14, %c0_15], %15 {strides = array<i32>} : memref<32x128xf32, #tpu.memory_space<vmem>>, vector<32x128xf32>,
    } else {
    }
    return
  }
  func.func @transform_0(%arg0: i32, %arg1: i32) -> (i32, i32) {
    %c0_i32 = arith.constant 0 : i32
    return %arg0, %arg1 : i32, i32
  }
  func.func @transform_1(%arg0: i32, %arg1: i32) -> (i32, i32) {
    %c0_i32 = arith.constant 0 : i32
    %c0_i32_0 = arith.constant 0 : i32
    return %arg1, %c0_i32 : i32, i32
  }
  func.func @transform_2(%arg0: i32, %arg1: i32) -> (i32, i32) {
    %c0_i32 = arith.constant 0 : i32
    %c0_i32_0 = arith.constant 0 : i32
    %c0_i32_1 = arith.constant 0 : i32
    return %c0_i32, %c0_i32_0 : i32, i32
  }
  func.func @transform_3(%arg0: i32, %arg1: i32) -> (i32, i32) {
    %c0_i32 = arith.constant 0 : i32
    %c0_i32_0 = arith.constant 0 : i32
    return %arg0, %c0_i32 : i32, i32
  }
}

module attributes {stable_mosaic.version = 11 : i64} {
  func.func @_matmul_kernel(%arg0: i32, %arg1: i32, %arg2: memref<128x16xbf16, #tpu.memory_space<vmem>>, %arg3: memref<16x128xbf16, #tpu.memory_space<vmem>>, %arg4: memref<1x128xf32, #tpu.memory_space<vmem>>, %arg5: memref<128x128xf32, #tpu.memory_space<vmem>>, %arg6: memref<128x128xf32, #tpu.memory_space<vmem>>, %arg7: memref<128x128xf32, #tpu.memory_space<vmem>>) attributes {dimension_semantics = [#tpu.dimension_semantics<parallel>, #tpu.dimension_semantics<arbitrary>], iteration_bounds = array<i64: 1, 1>, scalar_prefetch = 0 : i64, scratch_operands = 1 : i64, tpu.core_type = #tpu.core_type<tc>, window_params = [{transform_indices = @transform_0, window_bounds = array<i64: 128, 16>}, {transform_indices = @transform_1, window_bounds = array<i64: 16, 128>}, {pipeline_mode = #tpu.pipeline_mode<synchronous>, transform_indices = @transform_2, window_bounds = array<i64: 1, 128>}, {transform_indices = @transform_3, window_bounds = array<i64: 128, 128>}, {transform_indices = @transform_4, window_bounds = array<i64: 128, 128>}]} {
    %c0_i32 = arith.constant 0 : i32
    %0 = arith.cmpi eq, %arg1, %c0_i32 : i32
    %1 = arith.extui %0 : i1 to i32
    %c0_i32_0 = arith.constant 0 : i32
    %2 = arith.cmpi ne, %1, %c0_i32_0 : i32
    scf.if %2 {
      %cst_10 = arith.constant 0.000000e+00 : f32
      %12 = vector.broadcast %cst_10 : f32 to vector<128x128xf32>
      %c0_11 = arith.constant 0 : index
      %c0_12 = arith.constant 0 : index
      %13 = vector.load %arg7[%c0_11, %c0_12] : memref<128x128xf32, #tpu.memory_space<vmem>>, vector<128x128xf32>
      tpu.vector_store %arg7[%c0_11, %c0_12], %12 {strides = array<i32>} : memref<128x128xf32, #tpu.memory_space<vmem>>, vector<128x128xf32>,
    } else {
    }
    %c0 = arith.constant 0 : index
    %c0_1 = arith.constant 0 : index
    %3 = vector.load %arg7[%c0, %c0_1] : memref<128x128xf32, #tpu.memory_space<vmem>>, vector<128x128xf32>
    %c0_2 = arith.constant 0 : index
    %c0_3 = arith.constant 0 : index
    %4 = vector.load %arg2[%c0_2, %c0_3] : memref<128x16xbf16, #tpu.memory_space<vmem>>, vector<128x16xbf16>
    %c0_4 = arith.constant 0 : index
    %c0_5 = arith.constant 0 : index
    %5 = vector.load %arg3[%c0_4, %c0_5] : memref<16x128xbf16, #tpu.memory_space<vmem>>, vector<16x128xbf16>
    %cst = arith.constant dense<0.000000e+00> : vector<128x128xf32>
    %6 = tpu.matmul %4, %5, %cst {dimension_numbers = #tpu.dot_dimension_numbers<[1], [0], [0], [1], [0, 0, 1, 1], [], []>} : vector<128x16xbf16>, vector<16x128xbf16>, vector<128x128xf32> -> vector<128x128xf32>
    %7 = arith.addf %3, %6 : vector<128x128xf32>
    %c0_6 = arith.constant 0 : index
    %c0_7 = arith.constant 0 : index
    %8 = vector.load %arg7[%c0_6, %c0_7] : memref<128x128xf32, #tpu.memory_space<vmem>>, vector<128x128xf32>
    tpu.vector_store %arg7[%c0_6, %c0_7], %7 {strides = array<i32>} : memref<128x128xf32, #tpu.memory_space<vmem>>, vector<128x128xf32>,
    %c0_i32_8 = arith.constant 0 : i32
    %9 = arith.cmpi eq, %arg1, %c0_i32_8 : i32
    %10 = arith.extui %9 : i1 to i32
    %c0_i32_9 = arith.constant 0 : i32
    %11 = arith.cmpi ne, %10, %c0_i32_9 : i32
    scf.if %11 {
      %c0_10 = arith.constant 0 : index
      %c0_11 = arith.constant 0 : index
      %12 = vector.load %arg7[%c0_10, %c0_11] : memref<128x128xf32, #tpu.memory_space<vmem>>, vector<128x128xf32>
      %c0_12 = arith.constant 0 : index
      %c0_13 = arith.constant 0 : index
      %13 = vector.load %arg4[%c0_12, %c0_13] : memref<1x128xf32, #tpu.memory_space<vmem>>, vector<1x128xf32>
      %14 = vector.broadcast %13 : vector<1x128xf32> to vector<128x128xf32>
      %15 = arith.addf %12, %14 : vector<128x128xf32>
      %c0_14 = arith.constant 0 : index
      %c0_15 = arith.constant 0 : index
      %16 = vector.load %arg5[%c0_14, %c0_15] : memref<128x128xf32, #tpu.memory_space<vmem>>, vector<128x128xf32>
      %17 = arith.addf %15, %16 : vector<128x128xf32>
      %c0_16 = arith.constant 0 : index
      %c0_17 = arith.constant 0 : index
      %18 = vector.load %arg6[%c0_16, %c0_17] : memref<128x128xf32, #tpu.memory_space<vmem>>, vector<128x128xf32>
      tpu.vector_store %arg6[%c0_16, %c0_17], %17 {strides = array<i32>} : memref<128x128xf32, #tpu.memory_space<vmem>>, vector<128x128xf32>,
    } else {
    }
    return
  }
  func.func @transform_0(%arg0: i32, %arg1: i32) -> (i32, i32) {
    %c0_i32 = arith.constant 0 : i32
    return %arg0, %arg1 : i32, i32
  }
  func.func @transform_1(%arg0: i32, %arg1: i32) -> (i32, i32) {
    %c0_i32 = arith.constant 0 : i32
    %c0_i32_0 = arith.constant 0 : i32
    return %arg1, %c0_i32 : i32, i32
  }
  func.func @transform_2(%arg0: i32, %arg1: i32) -> (i32, i32) {
    %c0_i32 = arith.constant 0 : i32
    %c0_i32_0 = arith.constant 0 : i32
    %c0_i32_1 = arith.constant 0 : i32
    return %c0_i32, %c0_i32_0 : i32, i32
  }
  func.func @transform_3(%arg0: i32, %arg1: i32) -> (i32, i32) {
    %c0_i32 = arith.constant 0 : i32
    %c0_i32_0 = arith.constant 0 : i32
    return %arg0, %c0_i32 : i32, i32
  }
  func.func @transform_4(%arg0: i32, %arg1: i32) -> (i32, i32) {
    %c0_i32 = arith.constant 0 : i32
    %c0_i32_0 = arith.constant 0 : i32
    return %arg0, %c0_i32 : i32, i32
  }
}

module attributes {stable_mosaic.version = 11 : i64} {
  func.func @_matmul_kernel(%arg0: i32, %arg1: i32, %arg2: memref<128x144xbf16, #tpu.memory_space<vmem>>, %arg3: memref<144x128xbf16, #tpu.memory_space<vmem>>, %arg4: memref<1x128xf32, #tpu.memory_space<vmem>>, %arg5: memref<128x128xf32, #tpu.memory_space<vmem>>, %arg6: memref<128x128xf32, #tpu.memory_space<vmem>>) attributes {dimension_semantics = [#tpu.dimension_semantics<parallel>, #tpu.dimension_semantics<arbitrary>], iteration_bounds = array<i64: 1, 1>, scalar_prefetch = 0 : i64, scratch_operands = 1 : i64, tpu.core_type = #tpu.core_type<tc>, window_params = [{transform_indices = @transform_0, window_bounds = array<i64: 128, 144>}, {transform_indices = @transform_1, window_bounds = array<i64: 144, 128>}, {pipeline_mode = #tpu.pipeline_mode<synchronous>, transform_indices = @transform_2, window_bounds = array<i64: 1, 128>}, {transform_indices = @transform_3, window_bounds = array<i64: 128, 128>}]} {
    %c0_i32 = arith.constant 0 : i32
    %0 = arith.cmpi eq, %arg1, %c0_i32 : i32
    %1 = arith.extui %0 : i1 to i32
    %c0_i32_0 = arith.constant 0 : i32
    %2 = arith.cmpi ne, %1, %c0_i32_0 : i32
    scf.if %2 {
      %cst_10 = arith.constant 0.000000e+00 : f32
      %12 = vector.broadcast %cst_10 : f32 to vector<128x128xf32>
      %c0_11 = arith.constant 0 : index
      %c0_12 = arith.constant 0 : index
      %13 = vector.load %arg6[%c0_11, %c0_12] : memref<128x128xf32, #tpu.memory_space<vmem>>, vector<128x128xf32>
      tpu.vector_store %arg6[%c0_11, %c0_12], %12 {strides = array<i32>} : memref<128x128xf32, #tpu.memory_space<vmem>>, vector<128x128xf32>,
    } else {
    }
    %c0 = arith.constant 0 : index
    %c0_1 = arith.constant 0 : index
    %3 = vector.load %arg6[%c0, %c0_1] : memref<128x128xf32, #tpu.memory_space<vmem>>, vector<128x128xf32>
    %c0_2 = arith.constant 0 : index
    %c0_3 = arith.constant 0 : index
    %4 = vector.load %arg2[%c0_2, %c0_3] : memref<128x144xbf16, #tpu.memory_space<vmem>>, vector<128x144xbf16>
    %c0_4 = arith.constant 0 : index
    %c0_5 = arith.constant 0 : index
    %5 = vector.load %arg3[%c0_4, %c0_5] : memref<144x128xbf16, #tpu.memory_space<vmem>>, vector<144x128xbf16>
    %cst = arith.constant dense<0.000000e+00> : vector<128x128xf32>
    %6 = tpu.matmul %4, %5, %cst {dimension_numbers = #tpu.dot_dimension_numbers<[1], [0], [0], [1], [0, 0, 1, 1], [], []>} : vector<128x144xbf16>, vector<144x128xbf16>, vector<128x128xf32> -> vector<128x128xf32>
    %7 = arith.addf %3, %6 : vector<128x128xf32>
    %c0_6 = arith.constant 0 : index
    %c0_7 = arith.constant 0 : index
    %8 = vector.load %arg6[%c0_6, %c0_7] : memref<128x128xf32, #tpu.memory_space<vmem>>, vector<128x128xf32>
    tpu.vector_store %arg6[%c0_6, %c0_7], %7 {strides = array<i32>} : memref<128x128xf32, #tpu.memory_space<vmem>>, vector<128x128xf32>,
    %c0_i32_8 = arith.constant 0 : i32
    %9 = arith.cmpi eq, %arg1, %c0_i32_8 : i32
    %10 = arith.extui %9 : i1 to i32
    %c0_i32_9 = arith.constant 0 : i32
    %11 = arith.cmpi ne, %10, %c0_i32_9 : i32
    scf.if %11 {
      %c0_10 = arith.constant 0 : index
      %c0_11 = arith.constant 0 : index
      %12 = vector.load %arg6[%c0_10, %c0_11] : memref<128x128xf32, #tpu.memory_space<vmem>>, vector<128x128xf32>
      %c0_12 = arith.constant 0 : index
      %c0_13 = arith.constant 0 : index
      %13 = vector.load %arg4[%c0_12, %c0_13] : memref<1x128xf32, #tpu.memory_space<vmem>>, vector<1x128xf32>
      %14 = vector.broadcast %13 : vector<1x128xf32> to vector<128x128xf32>
      %15 = arith.addf %12, %14 : vector<128x128xf32>
      %c0_14 = arith.constant 0 : index
      %c0_15 = arith.constant 0 : index
      %16 = vector.load %arg5[%c0_14, %c0_15] : memref<128x128xf32, #tpu.memory_space<vmem>>, vector<128x128xf32>
      tpu.vector_store %arg5[%c0_14, %c0_15], %15 {strides = array<i32>} : memref<128x128xf32, #tpu.memory_space<vmem>>, vector<128x128xf32>,
    } else {
    }
    return
  }
  func.func @transform_0(%arg0: i32, %arg1: i32) -> (i32, i32) {
    %c0_i32 = arith.constant 0 : i32
    return %arg0, %arg1 : i32, i32
  }
  func.func @transform_1(%arg0: i32, %arg1: i32) -> (i32, i32) {
    %c0_i32 = arith.constant 0 : i32
    %c0_i32_0 = arith.constant 0 : i32
    return %arg1, %c0_i32 : i32, i32
  }
  func.func @transform_2(%arg0: i32, %arg1: i32) -> (i32, i32) {
    %c0_i32 = arith.constant 0 : i32
    %c0_i32_0 = arith.constant 0 : i32
    %c0_i32_1 = arith.constant 0 : i32
    return %c0_i32, %c0_i32_0 : i32, i32
  }
  func.func @transform_3(%arg0: i32, %arg1: i32) -> (i32, i32) {
    %c0_i32 = arith.constant 0 : i32
    %c0_i32_0 = arith.constant 0 : i32
    return %arg0, %c0_i32 : i32, i32
  }
}

</mosaic_0001>

<bundles_post_ra>
// kernel: a_call__.9
= control target key start
LH: loop header
LB: loop body
LE: loop exit
PB: predicated region body
PF: predicated region fallthrough
CT: control target
= control target key end

     0   :  { %vm123_vm0 = vcmask 261120   ;;  %s527_s1 = inlined_call_operand.vmem [shape: bf16[32,128], index: 1, kind: input, shape index: {}]   ;;  %s528_s0 = inlined_call_operand.vmem [shape: bf16[128,32], index: 0, kind: input, shape index: {}]   ;;  %s529_s2 = inlined_call_operand.vmem [shape: f32[1,128], index: 2, kind: input, shape index: {}]   ;;  %s530_s3 = inlined_call_operand.vmem [shape: f32[128,128], index: 3, kind: output, shape index: {}]  }
   0x1   :  { %v408_v0 = vld [vmem:[%s527_s1] sm:$0xff]   ;;  %v409_v1 = vld [vmem:[%s527_s1 + $0x8] sm:$0xff]   ;;  %v414_v6 = vld [vmem:[%s528_s0 + $0x10] sm:$0xff]  }
   0x2   :  { %384 = vmatprep.subr.bf16.mxu0 %v408_v0  ;;  %404 = vmatprep.subr.bf16.mxu1 %v408_v0  ;;  %v410_v2 = vld [vmem:[%s528_s0] sm:$0xff]   ;;  %v412_v4 = vld [vmem:[%s528_s0 + $0x8] sm:$0xff]   ;;  %v415_v7 = vld [vmem:[%s528_s0 + $0x30] sm:$0xff]  }
   0x3   :  { %385 = vmatpush3.bf16.msra.mxu0 %v408_v0  ;;  %406 = vmatpush3.bf16.msra.mxu1 %v408_v0  ;;  %v411_v3 = vld [vmem:[%s528_s0 + $0x20] sm:$0xff]   ;;  %v413_v5 = vld [vmem:[%s528_s0 + $0x28] sm:$0xff]   ;;  %v416_v8 = vld [vmem:[%s528_s0 + $0x18] sm:$0xff]  }
   0x4   :  { %386 = vmatprep.subr.bf16.mxu0 %v409_v1  ;;  %405 = vmatprep.subr.bf16.mxu1 %v409_v1  ;;  %v417_v9 = vld [vmem:[%s528_s0 + $0x38] sm:$0xff]   ;;  %v373_v10 = vld [vmem:[%s529_s2] ss:$0 sm:$0xff] }
   0x5   :  { %388 = vmatprep.mubr.msk.bf16.mxu0 %vm123_vm0, %v410_v2  ;;  %396 = vmatprep.mubr.msk.bf16.mxu1 %vm123_vm0, %v411_v3 }
   0x7   :  { %387 = vmatpush3.bf16.msra.mxu0 %v409_v1  ;;  %407 = vmatpush3.bf16.msra.mxu1 %v409_v1 }
   0xa   :  { %389 = vmatmul.mubr.msk.bf16.vlgmr.msra.gmra.mrb[0].mxu0 %vm123_vm0, %v412_v4  ;;  %397 = vmatmul.mubr.msk.bf16.vlgmr.msra.gmra.mrb[0].mxu1 %vm123_vm0, %v413_v5 }
   0xb   :  { %392 = vmatprep.mubr.msk.bf16.mxu0 %vm123_vm0, %v414_v6  ;;  %400 = vmatprep.mubr.msk.bf16.mxu1 %vm123_vm0, %v415_v7 }
  0x12   :  { %393 = vmatmul.mubr.msk.bf16.gmra.mrb[4].mxu0 %vm123_vm0, %v416_v8  ;;  %401 = vmatmul.mubr.msk.bf16.gmra.mrb[4].mxu1 %vm123_vm0, %v417_v9 }
  0xdd   :  { %v390_v11 = vpop.f32.mrb[0].mxu0  ;;  %v398_v12 = vpop.f32.mrb[0].mxu1 }
  0xde   :  { %v305_v13 = vadd.f32 %v390_v11, %v373_v10  ;;  %v313_v14 = vadd.f32 %v398_v12, %v373_v10  ;;  %v182_v15 = vpop.f32.mrb[1].mxu0  ;;  %v214_v16 = vpop.f32.mrb[1].mxu1 }
  0xdf   :  { %v303_v17 = vadd.f32 %v373_v10, %v182_v15  ;;  %v311_v18 = vadd.f32 %v373_v10, %v214_v16  ;;  %v391_v19 = vpop.f32.mrb[2].mxu0  ;;  %v399_v20 = vpop.f32.mrb[2].mxu1 }
  0xe0   :  { %v321_v21 = vmax.f32 %v305_v13, 0.0  ;;  %v329_v22 = vmax.f32 %v313_v14, 0.0  ;;  %v306_v23 = vadd.f32 %v391_v19, %v373_v10  ;;  %v314_v24 = vadd.f32 %v399_v20, %v373_v10  ;;  %v185_v25 = vpop.f32.mrb[3].mxu0  ;;  %v217_v26 = vpop.f32.mrb[3].mxu1 }
  0xe1   :  { %v319_v27 = vmax.f32 %v303_v17, 0.0  ;;  %v327_v28 = vmax.f32 %v311_v18, 0.0  ;;  %v304_v29 = vadd.f32 %v373_v10, %v185_v25  ;;  %v312_v30 = vadd.f32 %v373_v10, %v217_v26 }
  0xe2   :  { %337 = vst [vmem:[%s530_s3 + $0x10] sm:$0xff] %v321_v21  ;;  %345 = vst [vmem:[%s530_s3 + $0x50] sm:$0xff] %v329_v22  ;;  %v322_v31 = vmax.f32 %v306_v23, 0.0  ;;  %v330_v32 = vmax.f32 %v314_v24, 0.0 }
  0xe3   :  { %335 = vst [vmem:[%s530_s3] sm:$0xff] %v319_v27  ;;  %343 = vst [vmem:[%s530_s3 + $0x40] sm:$0xff] %v327_v28  ;;  %v320_v33 = vmax.f32 %v304_v29, 0.0  ;;  %v328_v34 = vmax.f32 %v312_v30, 0.0 }
  0xe4   :  { %338 = vst [vmem:[%s530_s3 + $0x18] sm:$0xff] %v322_v31  ;;  %346 = vst [vmem:[%s530_s3 + $0x58] sm:$0xff] %v330_v32 }
  0xe5   :  { %336 = vst [vmem:[%s530_s3 + $0x8] sm:$0xff] %v320_v33  ;;  %344 = vst [vmem:[%s530_s3 + $0x48] sm:$0xff] %v328_v34  ;;  %v394_v35 = vpop.f32.mrb[4].mxu0  ;;  %v402_v36 = vpop.f32.mrb[4].mxu1 }
  0xe6   :  { %v309_v37 = vadd.f32 %v394_v35, %v373_v10  ;;  %v317_v38 = vadd.f32 %v402_v36, %v373_v10  ;;  %v198_v39 = vpop.f32.mrb[5].mxu0  ;;  %v230_v40 = vpop.f32.mrb[5].mxu1 }
  0xe7   :  { %v307_v41 = vadd.f32 %v373_v10, %v198_v39  ;;  %v315_v42 = vadd.f32 %v373_v10, %v230_v40  ;;  %v395_v43 = vpop.f32.mrb[6].mxu0  ;;  %v403_v44 = vpop.f32.mrb[6].mxu1 }
  0xe8   :  { %v325_v45 = vmax.f32 %v309_v37, 0.0  ;;  %v333_v46 = vmax.f32 %v317_v38, 0.0  ;;  %v310_v47 = vadd.f32 %v395_v43, %v373_v10  ;;  %v318_v48 = vadd.f32 %v403_v44, %v373_v10  ;;  %v201_v49 = vpop.f32.mrb[7].mxu0  ;;  %v233_v50 = vpop.f32.mrb[7].mxu1 }
  0xe9   :  { %v323_v51 = vmax.f32 %v307_v41, 0.0  ;;  %v331_v52 = vmax.f32 %v315_v42, 0.0  ;;  %v308_v53 = vadd.f32 %v373_v10, %v201_v49  ;;  %v316_v54 = vadd.f32 %v373_v10, %v233_v50 }
  0xea   :  { %341 = vst [vmem:[%s530_s3 + $0x30] sm:$0xff] %v325_v45  ;;  %349 = vst [vmem:[%s530_s3 + $0x70] sm:$0xff] %v333_v46  ;;  %v326_v55 = vmax.f32 %v310_v47, 0.0  ;;  %v334_v56 = vmax.f32 %v318_v48, 0.0 }
  0xeb   :  { %339 = vst [vmem:[%s530_s3 + $0x20] sm:$0xff] %v323_v51  ;;  %347 = vst [vmem:[%s530_s3 + $0x60] sm:$0xff] %v331_v52  ;;  %v324_v57 = vmax.f32 %v308_v53, 0.0  ;;  %v332_v58 = vmax.f32 %v316_v54, 0.0 }
  0xec   :  { %342 = vst [vmem:[%s530_s3 + $0x38] sm:$0xff] %v326_v55  ;;  %350 = vst [vmem:[%s530_s3 + $0x78] sm:$0xff] %v334_v56 }
  0xed   :  { %340 = vst [vmem:[%s530_s3 + $0x28] sm:$0xff] %v324_v57  ;;  %348 = vst [vmem:[%s530_s3 + $0x68] sm:$0xff] %v332_v58 }

// kernel: a_call__.10
= control target key start
LH: loop header
LB: loop body
LE: loop exit
PB: predicated region body
PF: predicated region fallthrough
CT: control target
= control target key end

     0   :  { %vm81_vm0 = vcmask 654336   ;;  %s269_s1 = inlined_call_operand.vmem [shape: bf16[80,128], index: 1, kind: input, shape index: {}]   ;;  %s270_s0 = inlined_call_operand.vmem [shape: bf16[32,80], index: 0, kind: input, shape index: {}]   ;;  %s271_s2 = inlined_call_operand.vmem [shape: f32[1,128], index: 2, kind: input, shape index: {}]   ;;  %s272_s3 = inlined_call_operand.vmem [shape: f32[32,128], index: 3, kind: output, shape index: {}]  }
   0x1   :  { %v206_v0 = vld [vmem:[%s269_s1] sm:$0xff]   ;;  %v207_v1 = vld [vmem:[%s269_s1 + $0x8] sm:$0xff]   ;;  %v208_v2 = vld [vmem:[%s269_s1 + $0x10] sm:$0xff]  }
   0x2   :  { %192 = vmatprep.subr.bf16.mxu0 %v206_v0  ;;  %v211_v3 = vld [vmem:[%s270_s0] sm:$0xff]   ;;  %v209_v4 = vld [vmem:[%s269_s1 + $0x18] sm:$0xff]   ;;  %v212_v6 = vld [vmem:[%s270_s0 + $0x8] sm:$0xff]  }
   0x3   :  { %193 = vmatpush3.bf16.msra.mxu0 %v206_v0  ;;  %202 = vmatprep.mubr.msk.bf16.mxu0 %vm81_vm0, %v211_v3  ;;  %v210_v5 = vld [vmem:[%s269_s1 + $0x20] sm:$0xff]  }
   0x4   :  { %194 = vmatprep.subr.bf16.mxu0 %v207_v1  ;;  %v184_v7 = vld [vmem:[%s271_s2] ss:$0 sm:$0xff] }
   0x7   :  { %195 = vmatpush3.bf16.msra.mxu0 %v207_v1 }
   0x8   :  { %196 = vmatprep.subr.bf16.mxu0 %v208_v2 }
   0xb   :  { %197 = vmatpush3.bf16.msra.mxu0 %v208_v2 }
   0xc   :  { %198 = vmatprep.subr.bf16.mxu0 %v209_v4 }
   0xf   :  { %199 = vmatpush3.bf16.msra.mxu0 %v209_v4 }
  0x10   :  { %200 = vmatprep.subr.bf16.mxu0 %v210_v5 }
  0x13   :  { %201 = vmatpush3.bf16.msra.mxu0 %v210_v5 }
  0x16   :  { %203 = vmatmul.mubr.msk.bf16.vlgmr.msra.gmra.mrb[0].mxu0 %vm81_vm0, %v212_v6 }
  0xe9   :  { %v204_v8 = vpop.f32.mrb[0].mxu0 }
  0xea   :  { %v161_v9 = vadd.f32 %v204_v8, %v184_v7  ;;  %v122_v10 = vpop.f32.mrb[1].mxu0 }
  0xeb   :  { %v159_v11 = vadd.f32 %v184_v7, %v122_v10  ;;  %v205_v12 = vpop.f32.mrb[2].mxu0 }
  0xec   :  { %v165_v13 = vmax.f32 %v161_v9, 0.0  ;;  %v162_v14 = vadd.f32 %v205_v12, %v184_v7  ;;  %v125_v15 = vpop.f32.mrb[3].mxu0 }
  0xed   :  { %v163_v16 = vmax.f32 %v159_v11, 0.0  ;;  %v160_v17 = vadd.f32 %v184_v7, %v125_v15 }
  0xee   :  { %169 = vst [vmem:[%s272_s3 + $0x10] sm:$0xff] %v165_v13  ;;  %v166_v18 = vmax.f32 %v162_v14, 0.0 }
  0xef   :  { %167 = vst [vmem:[%s272_s3] sm:$0xff] %v163_v16  ;;  %v164_v19 = vmax.f32 %v160_v17, 0.0 }
  0xf0   :  { %170 = vst [vmem:[%s272_s3 + $0x18] sm:$0xff] %v166_v18 }
  0xf1   :  { %168 = vst [vmem:[%s272_s3 + $0x8] sm:$0xff] %v164_v19 }

// kernel: a_call__.12
= control target key start
LH: loop header
LB: loop body
LE: loop exit
PB: predicated region body
PF: predicated region fallthrough
CT: control target
= control target key end

     0   :  { %v136_v0 = vmov 0.0   ;;  %vm137_vm0 = vmmov 0   ;;  %vm46_vm1 = vcmask 261120   ;;  %s176_s1 = inlined_call_operand.vmem [shape: bf16[32,128], index: 1, kind: input, shape index: {}]   ;;  %s177_s0 = inlined_call_operand.vmem [shape: bf16[16,32], index: 0, kind: input, shape index: {}]   ;;  %s178_s2 = inlined_call_operand.vmem [shape: f32[1,128], index: 2, kind: input, shape index: {}]   ;;  %s179_s3 = inlined_call_operand.vmem [shape: f32[16,128], index: 3, kind: output, shape index: {}]  }
   0x1   :  { %123 = vmatprep.subr.bf16.mxu0 %v136_v0  ;;  %v133_v1 = vld [vmem:[%s176_s1] sm:$0xff]   ;;  %127 = vmatprep.mubr.msk.bf16.mxu0 %vm137_vm0, %v136_v0  ;;  %v134_v2 = vld [vmem:[%s176_s1 + $0x8] sm:$0xff]  }
   0x2   :  { %124 = vmatpush3.bf16.msra.mxu0 %v133_v1  ;;  %v135_v3 = vld [vmem:[%s177_s0] sm:$0xff]  }
   0x3   :  { %125 = vmatprep.subr.bf16.mxu0 %v136_v0  ;;  %v119_v4 = vld [vmem:[%s178_s2] ss:$0 sm:$0xff] }
   0x6   :  { %126 = vmatpush3.bf16.msra.mxu0 %v134_v2 }
   0x9   :  { %128 = vmatmul.mubr.msk.bf16.vlgmr.msra.gmra.mrb[0].mxu0 %vm46_vm1, %v135_v3 }
  0xdc   :  { %v84_v5 = vpop.f32.mrb[0].mxu0 }
  0xdd   :  { %v107_v6 = vadd.f32 %v119_v4, %v84_v5  ;;  %v129_v7 = vpop.f32.mrb[1].mxu0 }
  0xde   :  { %v87_v8 = vpop.f32.mrb[2].mxu0 }
  0xdf   :  { %109 = vst [vmem:[%s179_s3] sm:$0xff] %v107_v6  ;;  %v108_v9 = vadd.f32 %v119_v4, %v87_v8  ;;  %v130_v10 = vpop.f32.mrb[3].mxu0 }
  0xe1   :  { %110 = vst [vmem:[%s179_s3 + $0x8] sm:$0xff] %v108_v9 }

// kernel: a_call__.11
= control target key start
LH: loop header
LB: loop body
LE: loop exit
PB: predicated region body
PF: predicated region fallthrough
CT: control target
= control target key end

     0   :  { %v203_v0 = vmov 0   ;;  %vm106_vm0 = vcmask 130048   ;;  %s266_s1 = inlined_call_operand.vmem [shape: bf16[144,128], index: 1, kind: input, shape index: {}]   ;;  %s267_s0 = inlined_call_operand.vmem [shape: bf16[16,144], index: 0, kind: input, shape index: {}]   ;;  %s268_s2 = inlined_call_operand.vmem [shape: f32[1,128], index: 2, kind: input, shape index: {}]   ;;  %s269_s3 = inlined_call_operand.vmem [shape: f32[16,128], index: 3, kind: output, shape index: {}]  }
   0x1   :  { %110 = vmatprep.subr.bf16.mxu0 %v203_v0  ;;  %v191_v1 = vld [vmem:[%s266_s1] sm:$0xff]   ;;  %v192_v2 = vld [vmem:[%s266_s1 + $0x8] sm:$0xff]   ;;  %v193_v3 = vld [vmem:[%s266_s1 + $0x10] sm:$0xff]  }
   0x2   :  { %111 = vmatpush1.bf16.msra.mxu0 %v191_v1  ;;  %v194_v4 = vld [vmem:[%s266_s1 + $0x18] sm:$0xff]   ;;  %v202_v5 = vld [vmem:[%s267_s0 + $0x4] ss:$8 sps:$4 sm:$0xff]   ;;  %v197_v8 = vld [vmem:[%s266_s1 + $0x30] sm:$0xff]  }
   0x3   :  { %112 = vmatprep.subr.bf16.mxu0 %v203_v0  ;;  %188 = vmatprep.mubr.msk.bf16.mxu0 %vm106_vm0, %v202_v5  ;;  %v195_v6 = vld [vmem:[%s266_s1 + $0x20] sm:$0xff]   ;;  %v196_v7 = vld [vmem:[%s266_s1 + $0x28] sm:$0xff]   ;;  %v198_v9 = vld [vmem:[%s266_s1 + $0x38] sm:$0xff]  }
   0x4   :  { %v199_v10 = vld [vmem:[%s266_s1 + $0x40] sm:$0xff]  }
   0x5   :  { %v200_v11 = vld [vmem:[%s267_s0] ss:$8 sps:$4 sm:$0xff]  }
   0x6   :  { %113 = vmatpush1.bf16.msra.mxu0 %v192_v2  ;;  %v189_v12 = vld [vmem:[%s268_s2] ss:$0 sm:$0xff] }
   0x7   :  { %114 = vmatprep.subr.bf16.mxu0 %v203_v0 }
   0xa   :  { %115 = vmatpush1.bf16.msra.mxu0 %v193_v3 }
   0xb   :  { %116 = vmatprep.subr.bf16.mxu0 %v203_v0 }
   0xe   :  { %117 = vmatpush1.bf16.msra.mxu0 %v194_v4 }
   0xf   :  { %118 = vmatprep.subr.bf16.mxu0 %v203_v0 }
  0x12   :  { %119 = vmatpush1.bf16.msra.mxu0 %v195_v6 }
  0x13   :  { %120 = vmatprep.subr.bf16.mxu0 %v203_v0 }
  0x16   :  { %121 = vmatpush1.bf16.msra.mxu0 %v196_v7 }
  0x17   :  { %122 = vmatprep.subr.bf16.mxu0 %v203_v0 }
  0x1a   :  { %123 = vmatpush1.bf16.msra.mxu0 %v197_v8 }
  0x1b   :  { %124 = vmatprep.subr.bf16.mxu0 %v203_v0 }
  0x1e   :  { %125 = vmatpush1.bf16.msra.mxu0 %v198_v9 }
  0x1f   :  { %126 = vmatprep.subr.bf16.mxu0 %v203_v0 }
  0x22   :  { %127 = vmatpush1.bf16.msra.mxu0 %v199_v10 }
  0x25   :  { %143 = vmatmul.mubr.bf16.vlgmr.msra.gmra.mrb[0].mxu0 %v200_v11 }
  0xf8   :  { %v144_v13 = vpop.f32.mrb[0].mxu0 }
  0xf9   :  { %v167_v14 = vadd.f32 %v189_v12, %v144_v13  ;;  %v146_v15 = vpop.f32.mrb[1].mxu0 }
  0xfa   :  { %v147_v16 = vpop.f32.mrb[2].mxu0 }
  0xfb   :  { %v169_v17 = vmax.f32 %v167_v14, 0.0  ;;  %v168_v18 = vadd.f32 %v189_v12, %v147_v16  ;;  %v149_v19 = vpop.f32.mrb[3].mxu0 }
  0xfd   :  { %171 = vst [vmem:[%s269_s3] sm:$0xff] %v169_v17  ;;  %v170_v20 = vmax.f32 %v168_v18, 0.0 }
  0xff   :  { %172 = vst [vmem:[%s269_s3 + $0x8] sm:$0xff] %v170_v20 }

// kernel: a_call__.17
= control target key start
LH: loop header
LB: loop body
LE: loop exit
PB: predicated region body
PF: predicated region fallthrough
CT: control target
= control target key end

     0   :  { %v201_v0 = vmov 0   ;;  %vm106_vm0 = vcmask 130048   ;;  %s264_s1 = inlined_call_operand.vmem [shape: bf16[144,128], index: 1, kind: input, shape index: {}]   ;;  %s265_s0 = inlined_call_operand.vmem [shape: bf16[16,144], index: 0, kind: input, shape index: {}]   ;;  %s266_s2 = inlined_call_operand.vmem [shape: f32[1,128], index: 2, kind: input, shape index: {}]   ;;  %s267_s3 = inlined_call_operand.vmem [shape: f32[16,128], index: 3, kind: output, shape index: {}]  }
   0x1   :  { %110 = vmatprep.subr.bf16.mxu0 %v201_v0  ;;  %v189_v1 = vld [vmem:[%s264_s1] sm:$0xff]   ;;  %v190_v2 = vld [vmem:[%s264_s1 + $0x8] sm:$0xff]   ;;  %v191_v3 = vld [vmem:[%s264_s1 + $0x10] sm:$0xff]  }
   0x2   :  { %111 = vmatpush1.bf16.msra.mxu0 %v189_v1  ;;  %v192_v4 = vld [vmem:[%s264_s1 + $0x18] sm:$0xff]   ;;  %v200_v5 = vld [vmem:[%s265_s0 + $0x4] ss:$8 sps:$4 sm:$0xff]   ;;  %v195_v8 = vld [vmem:[%s264_s1 + $0x30] sm:$0xff]  }
   0x3   :  { %112 = vmatprep.subr.bf16.mxu0 %v201_v0  ;;  %186 = vmatprep.mubr.msk.bf16.mxu0 %vm106_vm0, %v200_v5  ;;  %v193_v6 = vld [vmem:[%s264_s1 + $0x20] sm:$0xff]   ;;  %v194_v7 = vld [vmem:[%s264_s1 + $0x28] sm:$0xff]   ;;  %v196_v9 = vld [vmem:[%s264_s1 + $0x38] sm:$0xff]  }
   0x4   :  { %v197_v10 = vld [vmem:[%s264_s1 + $0x40] sm:$0xff]  }
   0x5   :  { %v198_v11 = vld [vmem:[%s265_s0] ss:$8 sps:$4 sm:$0xff]  }
   0x6   :  { %113 = vmatpush1.bf16.msra.mxu0 %v190_v2  ;;  %v187_v12 = vld [vmem:[%s266_s2] ss:$0 sm:$0xff] }
   0x7   :  { %114 = vmatprep.subr.bf16.mxu0 %v201_v0 }
   0xa   :  { %115 = vmatpush1.bf16.msra.mxu0 %v191_v3 }
   0xb   :  { %116 = vmatprep.subr.bf16.mxu0 %v201_v0 }
   0xe   :  { %117 = vmatpush1.bf16.msra.mxu0 %v192_v4 }
   0xf   :  { %118 = vmatprep.subr.bf16.mxu0 %v201_v0 }
  0x12   :  { %119 = vmatpush1.bf16.msra.mxu0 %v193_v6 }
  0x13   :  { %120 = vmatprep.subr.bf16.mxu0 %v201_v0 }
  0x16   :  { %121 = vmatpush1.bf16.msra.mxu0 %v194_v7 }
  0x17   :  { %122 = vmatprep.subr.bf16.mxu0 %v201_v0 }
  0x1a   :  { %123 = vmatpush1.bf16.msra.mxu0 %v195_v8 }
  0x1b   :  { %124 = vmatprep.subr.bf16.mxu0 %v201_v0 }
  0x1e   :  { %125 = vmatpush1.bf16.msra.mxu0 %v196_v9 }
  0x1f   :  { %126 = vmatprep.subr.bf16.mxu0 %v201_v0 }
  0x22   :  { %127 = vmatpush1.bf16.msra.mxu0 %v197_v10 }
  0x25   :  { %143 = vmatmul.mubr.bf16.vlgmr.msra.gmra.mrb[0].mxu0 %v198_v11 }
  0xf8   :  { %v144_v13 = vpop.f32.mrb[0].mxu0 }
  0xf9   :  { %v167_v14 = vadd.f32 %v187_v12, %v144_v13  ;;  %v146_v15 = vpop.f32.mrb[1].mxu0 }
  0xfa   :  { %v147_v16 = vpop.f32.mrb[2].mxu0 }
  0xfb   :  { %169 = vst [vmem:[%s267_s3] sm:$0xff] %v167_v14  ;;  %v168_v17 = vadd.f32 %v187_v12, %v147_v16  ;;  %v149_v18 = vpop.f32.mrb[3].mxu0 }
  0xfd   :  { %170 = vst [vmem:[%s267_s3 + $0x8] sm:$0xff] %v168_v17 }

// kernel: a_call__.13
= control target key start
LH: loop header
LB: loop body
LE: loop exit
PB: predicated region body
PF: predicated region fallthrough
CT: control target
= control target key end

     0   :  { %vm52_vm0 = vcmask 130048   ;;  %s229_s1 = inlined_call_operand.vmem [shape: bf16[16,128], index: 1, kind: input, shape index: {}]   ;;  %s230_s0 = inlined_call_operand.vmem [shape: bf16[32,16], index: 0, kind: input, shape index: {}]   ;;  %s231_s2 = inlined_call_operand.vmem [shape: f32[1,128], index: 2, kind: input, shape index: {}]   ;;  %s232_s3 = inlined_call_operand.vmem [shape: f32[32,128], index: 3, kind: input, shape index: {}]   ;;  %s233_s4 = inlined_call_operand.vmem [shape: f32[32,128], index: 4, kind: output, shape index: {}]  }
   0x1   :  { %v165_v0 = vld [vmem:[%s229_s1] sm:$0xff]   ;;  %v167_v2 = vld [vmem:[%s230_s0 + $0x8] sm:$0xff]   ;;  %v136_v5 = vld [vmem:[%s232_s3 + $0x10] sm:$0xff] }
   0x2   :  { %v166_v1 = vld [vmem:[%s230_s0] sm:$0xff]   ;;  %159 = vmatprep.subr.bf16.mxu0 %v165_v0  ;;  %v137_v11 = vld [vmem:[%s232_s3 + $0x18] sm:$0xff]  ;;  %v135_v15 = vld [vmem:[%s232_s3 + $0x8] sm:$0xff] }
   0x3   :  { %160 = vmatpush3.bf16.msra.mxu0 %v165_v0  ;;  %161 = vmatprep.mubr.msk.bf16.mxu0 %vm52_vm0, %v166_v1  ;;  %v155_v3 = vld [vmem:[%s231_s2] ss:$0 sm:$0xff] }
   0x4   :  { %v134_v8 = vld [vmem:[%s232_s3] sm:$0xff] }
   0x6   :  { %162 = vmatmul.mubr.msk.bf16.vlgmr.msra.gmra.mrb[0].mxu0 %vm52_vm0, %v167_v2 }
  0xd9   :  { %v163_v4 = vpop.f32.mrb[0].mxu0 }
  0xda   :  { %v132_v6 = vadd.f32 %v163_v4, %v155_v3  ;;  %v93_v7 = vpop.f32.mrb[1].mxu0 }
  0xdb   :  { %v130_v9 = vadd.f32 %v155_v3, %v93_v7  ;;  %v164_v10 = vpop.f32.mrb[2].mxu0 }
  0xdc   :  { %v140_v12 = vadd.f32 %v136_v5, %v132_v6  ;;  %v133_v13 = vadd.f32 %v164_v10, %v155_v3  ;;  %v96_v14 = vpop.f32.mrb[3].mxu0 }
  0xdd   :  { %v138_v16 = vadd.f32 %v134_v8, %v130_v9  ;;  %v131_v17 = vadd.f32 %v155_v3, %v96_v14 }
  0xde   :  { %144 = vst [vmem:[%s233_s4 + $0x10] sm:$0xff] %v140_v12  ;;  %v141_v18 = vadd.f32 %v137_v11, %v133_v13 }
  0xdf   :  { %142 = vst [vmem:[%s233_s4] sm:$0xff] %v138_v16  ;;  %v139_v19 = vadd.f32 %v135_v15, %v131_v17 }
  0xe0   :  { %145 = vst [vmem:[%s233_s4 + $0x18] sm:$0xff] %v141_v18 }
  0xe1   :  { %143 = vst [vmem:[%s233_s4 + $0x8] sm:$0xff] %v139_v19 }

// kernel: a_call__.16
= control target key start
LH: loop header
LB: loop body
LE: loop exit
PB: predicated region body
PF: predicated region fallthrough
CT: control target
= control target key end

     0   :  { %v301_v1 = vmov 0   ;;  %vm122_vm0 = vcmask 130048   ;;  %s379_s0 = inlined_call_operand.vmem [shape: bf16[32,144], index: 0, kind: input, shape index: {}]   ;;  %s380_s1 = inlined_call_operand.vmem [shape: bf16[144,128], index: 1, kind: input, shape index: {}]   ;;  %s381_s2 = inlined_call_operand.vmem [shape: f32[1,128], index: 2, kind: input, shape index: {}]   ;;  %s382_s3 = inlined_call_operand.hbm [shape: f32[32,128], index: 3, kind: output, shape index: {}]  }
   0x1   :  { %v262_v0 = vld [vmem:[%s380_s1] sm:$0xff]   ;;  %129 = vmatprep.subr.bf16.mxu0 %v301_v1  ;;  %240 = vmatprep.subr.bf16.mxu1 %v301_v1  ;;  %v263_v2 = vld [vmem:[%s380_s1 + $0x8] sm:$0xff]   ;;  %v264_v3 = vld [vmem:[%s380_s1 + $0x10] sm:$0xff]  }
   0x2   :  { %130 = vmatpush1.bf16.msra.mxu0 %v262_v0  ;;  %249 = vmatpush1.bf16.msra.mxu1 %v262_v0  ;;  %v265_v4 = vld [vmem:[%s380_s1 + $0x18] sm:$0xff]   ;;  %v273_v5 = vld [vmem:[%s379_s0 + $0x4] ss:$8 sps:$4 sm:$0xff]  }
   0x3   :  { %131 = vmatprep.subr.bf16.mxu0 %v301_v1  ;;  %241 = vmatprep.subr.bf16.mxu1 %v301_v1  ;;  %v276_v6 = vld [vmem:[%s379_s0 + $0x14] ss:$8 sps:$4 sm:$0xff]  }
   0x6   :  { %132 = vmatpush1.bf16.msra.mxu0 %v263_v2  ;;  %250 = vmatpush1.bf16.msra.mxu1 %v263_v2 }
   0x7   :  { %133 = vmatprep.subr.bf16.mxu0 %v301_v1  ;;  %242 = vmatprep.subr.bf16.mxu1 %v301_v1 }
   0xa   :  { %134 = vmatpush1.bf16.msra.mxu0 %v264_v3  ;;  %251 = vmatpush1.bf16.msra.mxu1 %v264_v3 }
   0xb   :  { %135 = vmatprep.subr.bf16.mxu0 %v301_v1  ;;  %243 = vmatprep.subr.bf16.mxu1 %v301_v1 }
   0xc   :  { %8 = vsyncpa [#allocation4], 0  ;;  %237 = vmatprep.mubr.msk.bf16.mxu0 %vm122_vm0, %v273_v5  ;;  %238 = vmatprep.mubr.msk.bf16.mxu1 %vm122_vm0, %v276_v6  ;;  %v266_v7 = vld [vmem:[%s380_s1 + $0x20] sm:$0xff]   ;;  %v267_v8 = vld [vmem:[%s380_s1 + $0x28] sm:$0xff]   ;;  %s302_s13 = smov [#allocation3]  }
   0xd   :  { %v268_v9 = vld [vmem:[%s380_s1 + $0x30] sm:$0xff]   ;;  %v269_v10 = vld [vmem:[%s380_s1 + $0x38] sm:$0xff]   ;;  %v270_v11 = vld [vmem:[%s380_s1 + $0x40] sm:$0xff]   ;;  %s213_s1 = sshll.u32 %s302_s13, 4  ;;  %s214_s1 = int_to_ptr.vmem [resolvable:$true] %s213_s1 }
   0xe   :  { %136 = vmatpush1.bf16.msra.mxu0 %v265_v4  ;;  %252 = vmatpush1.bf16.msra.mxu1 %v265_v4  ;;  %v271_v12 = vld [vmem:[%s379_s0] ss:$8 sps:$4 sm:$0xff]   ;;  %v274_v13 = vld [vmem:[%s379_s0 + $0x10] ss:$8 sps:$4 sm:$0xff]   ;;  %s277_s0 = scalar_lea.vmem %s214_s1, 512  ;;  %p282_p1 = scmp.lt.s32.totalorder %s214_s1, %s214_s1 }
   0xf   :  { %137 = vmatprep.subr.bf16.mxu0 %v301_v1  ;;  %244 = vmatprep.subr.bf16.mxu1 %v301_v1  ;;  %v239_v14 = vld [vmem:[%s381_s2] ss:$0 sm:$0xff]  ;;  %p278_p0 = scmp.ne.s32.totalorder %s214_s1, %s277_s0  ;;  %p283_p2 = scmp.lt.s32.totalorder %s277_s0, %s277_s0 }
  0x11   :  { %p284_p3 = por %p283_p2, %p282_p1 }
  0x12   :  { %138 = vmatpush1.bf16.msra.mxu0 %v266_v7  ;;  %253 = vmatpush1.bf16.msra.mxu1 %v266_v7 }
  0x13   :  { %139 = vmatprep.subr.bf16.mxu0 %v301_v1  ;;  %245 = vmatprep.subr.bf16.mxu1 %v301_v1  ;;  %p285_p4 = pnand %p284_p3, %p278_p0 }
  0x16   :  { %140 = vmatpush1.bf16.msra.mxu0 %v267_v8  ;;  %254 = vmatpush1.bf16.msra.mxu1 %v267_v8 }
  0x17   :  { %141 = vmatprep.subr.bf16.mxu0 %v301_v1  ;;  %246 = vmatprep.subr.bf16.mxu1 %v301_v1 }
  0x1a   :  { %142 = vmatpush1.bf16.msra.mxu0 %v268_v9  ;;  %255 = vmatpush1.bf16.msra.mxu1 %v268_v9 }
  0x1b   :  { %143 = vmatprep.subr.bf16.mxu0 %v301_v1  ;;  %247 = vmatprep.subr.bf16.mxu1 %v301_v1 }
  0x1e   :  { %144 = vmatpush1.bf16.msra.mxu0 %v269_v10  ;;  %256 = vmatpush1.bf16.msra.mxu1 %v269_v10 }
  0x1f   :  { %145 = vmatprep.subr.bf16.mxu0 %v301_v1  ;;  %248 = vmatprep.subr.bf16.mxu1 %v301_v1 }
  0x22   :  { %146 = vmatpush1.bf16.msra.mxu0 %v270_v11  ;;  %257 = vmatpush1.bf16.msra.mxu1 %v270_v11 }
  0x25   :  { %162 = vmatmul.mubr.bf16.vlgmr.msra.gmra.mrb[0].mxu0 %v271_v12  ;;  %170 = vmatmul.mubr.bf16.vlgmr.msra.gmra.mrb[0].mxu1 %v274_v13 }
  0xf8   :  { %v163_v15 = vpop.f32.mrb[0].mxu0  ;;  %v171_v16 = vpop.f32.mrb[0].mxu1 }
  0xf9   :  { %v200_v17 = vadd.f32 %v239_v14, %v163_v15  ;;  %v202_v18 = vadd.f32 %v239_v14, %v171_v16  ;;  %v165_v19 = vpop.f32.mrb[1].mxu0  ;;  %v173_v20 = vpop.f32.mrb[1].mxu1 }
  0xfa   :  { %v166_v21 = vpop.f32.mrb[2].mxu0  ;;  %v174_v22 = vpop.f32.mrb[2].mxu1 }
  0xfb   :  { %204 = vst [vmem:[#allocation3] sm:$0xff] %v200_v17  ;;  %206 = vst [vmem:[#allocation3 + $0x10] sm:$0xff] %v202_v18  ;;  %v201_v23 = vadd.f32 %v239_v14, %v166_v21  ;;  %v203_v24 = vadd.f32 %v239_v14, %v174_v22  ;;  %v168_v25 = vpop.f32.mrb[3].mxu0  ;;  %v176_v26 = vpop.f32.mrb[3].mxu1 }
  0xfd   :  { %205 = vst [vmem:[#allocation3 + $0x8] sm:$0xff] %v201_v23  ;;  %207 = vst [vmem:[#allocation3 + $0x18] sm:$0xff] %v203_v24 }
  0xfe   :  { %288 = shalt.err (!%p285_p4)
}
  0xff   :  { %s289_s15 = scalar_lea.hbm %s382_s3, 512 }
 0x100   :  { %p290_p5 = scmp.ne.s32.totalorder %s382_s3, %s289_s15  ;;  %p293_p6 = scmp.lt.u32.totalorder %s289_s15, %s382_s3 }
 0x102   :  { %p295_p7 = pnand %p293_p6, %p290_p5 }
 0x104   :  { %298 = shalt.err (!%p295_p7)
}
 0x105   :  { %s303_s20 = smov 128   ;;  %s304_s21 = smov 8  }
 0x106   :  { %219 = dma.vmem_to_hbm [thread:$0]  %s214_s1, 512, %s382_s3, [#allocation4], %s303_s20, %s303_s20, %s304_s21  }
 0x107   :  { %299 = dma.done.wait [#allocation4], 512  }
 0x108   :  { %300 = vsyncadd [#allocation4], 4294966784 }
 0x109   :  { %223 = vsyncpa [#allocation4], 1 }

// kernel: a_call__.14
= control target key start
LH: loop header
LB: loop body
LE: loop exit
PB: predicated region body
PF: predicated region fallthrough
CT: control target
= control target key end

     0   :  { %vm118_vm0 = vcmask 130048   ;;  %s599_s1 = inlined_call_operand.vmem [shape: bf16[16,128], index: 1, kind: input, shape index: {}]   ;;  %s600_s0 = inlined_call_operand.vmem [shape: bf16[128,16], index: 0, kind: input, shape index: {}]   ;;  %s601_s2 = inlined_call_operand.vmem [shape: f32[1,128], index: 2, kind: input, shape index: {}]   ;;  %s602_s3 = inlined_call_operand.vmem [shape: f32[128,128], index: 3, kind: input, shape index: {}]   ;;  %s603_s4 = inlined_call_operand.vmem [shape: f32[128,128], index: 4, kind: output, shape index: {}]  }
   0x1   :  { %v413_v0 = vld [vmem:[%s599_s1] sm:$0xff]   ;;  %v416_v3 = vld [vmem:[%s600_s0 + $0x8] sm:$0xff]   ;;  %v418_v5 = vld [vmem:[%s600_s0 + $0x10] sm:$0xff]  }
   0x2   :  { %v414_v1 = vld [vmem:[%s600_s0] sm:$0xff]   ;;  %393 = vmatprep.subr.bf16.mxu0 %v413_v0  ;;  %411 = vmatprep.subr.bf16.mxu1 %v413_v0  ;;  %v417_v4 = vld [vmem:[%s600_s0 + $0x28] sm:$0xff]   ;;  %v419_v6 = vld [vmem:[%s600_s0 + $0x30] sm:$0xff]  }
   0x3   :  { %v415_v2 = vld [vmem:[%s600_s0 + $0x20] sm:$0xff]   ;;  %394 = vmatpush3.bf16.msra.mxu0 %v413_v0  ;;  %412 = vmatpush3.bf16.msra.mxu1 %v413_v0  ;;  %v420_v7 = vld [vmem:[%s600_s0 + $0x18] sm:$0xff]   ;;  %v316_v11 = vld [vmem:[%s602_s3 + $0x10] sm:$0xff] }
   0x4   :  { %395 = vmatprep.mubr.msk.bf16.mxu0 %vm118_vm0, %v414_v1  ;;  %403 = vmatprep.mubr.msk.bf16.mxu1 %vm118_vm0, %v415_v2  ;;  %v421_v8 = vld [vmem:[%s600_s0 + $0x38] sm:$0xff]   ;;  %v485_v9 = vld [vmem:[%s601_s2] ss:$0 sm:$0xff]  ;;  %v324_v13 = vld [vmem:[%s602_s3 + $0x50] sm:$0xff] }
   0x5   :  { %v314_v17 = vld [vmem:[%s602_s3] sm:$0xff]  ;;  %v317_v23 = vld [vmem:[%s602_s3 + $0x18] sm:$0xff]  ;;  %v315_v31 = vld [vmem:[%s602_s3 + $0x8] sm:$0xff] }
   0x6   :  { %396 = vmatmul.mubr.msk.bf16.vlgmr.msra.gmra.mrb[0].mxu0 %vm118_vm0, %v416_v3  ;;  %404 = vmatmul.mubr.msk.bf16.vlgmr.msra.gmra.mrb[0].mxu1 %vm118_vm0, %v417_v4  ;;  %v322_v19 = vld [vmem:[%s602_s3 + $0x40] sm:$0xff]  ;;  %v325_v25 = vld [vmem:[%s602_s3 + $0x58] sm:$0xff]  ;;  %v323_v33 = vld [vmem:[%s602_s3 + $0x48] sm:$0xff] }
   0x7   :  { %399 = vmatprep.mubr.msk.bf16.mxu0 %vm118_vm0, %v418_v5  ;;  %407 = vmatprep.mubr.msk.bf16.mxu1 %vm118_vm0, %v419_v6  ;;  %v320_v43 = vld [vmem:[%s602_s3 + $0x30] sm:$0xff]  ;;  %v318_v49 = vld [vmem:[%s602_s3 + $0x20] sm:$0xff]  ;;  %v321_v55 = vld [vmem:[%s602_s3 + $0x38] sm:$0xff] }
   0x8   :  { %v328_v45 = vld [vmem:[%s602_s3 + $0x70] sm:$0xff]  ;;  %v326_v51 = vld [vmem:[%s602_s3 + $0x60] sm:$0xff]  ;;  %v329_v57 = vld [vmem:[%s602_s3 + $0x78] sm:$0xff] }
   0x9   :  { %v319_v63 = vld [vmem:[%s602_s3 + $0x28] sm:$0xff] }
   0xa   :  { %v327_v1 = vld [vmem:[%s602_s3 + $0x68] sm:$0xff] }
   0xe   :  { %400 = vmatmul.mubr.msk.bf16.gmra.mrb[4].mxu0 %vm118_vm0, %v420_v7  ;;  %408 = vmatmul.mubr.msk.bf16.gmra.mrb[4].mxu1 %vm118_vm0, %v421_v8 }
  0xd9   :  { %v397_v10 = vpop.f32.mrb[0].mxu0  ;;  %v405_v12 = vpop.f32.mrb[0].mxu1 }
  0xda   :  { %v300_v14 = vadd.f32 %v397_v10, %v485_v9  ;;  %v308_v15 = vadd.f32 %v405_v12, %v485_v9  ;;  %v177_v16 = vpop.f32.mrb[1].mxu0  ;;  %v209_v18 = vpop.f32.mrb[1].mxu1 }
  0xdb   :  { %v298_v20 = vadd.f32 %v485_v9, %v177_v16  ;;  %v306_v21 = vadd.f32 %v485_v9, %v209_v18  ;;  %v398_v22 = vpop.f32.mrb[2].mxu0  ;;  %v406_v24 = vpop.f32.mrb[2].mxu1 }
  0xdc   :  { %v332_v26 = vadd.f32 %v316_v11, %v300_v14  ;;  %v340_v27 = vadd.f32 %v324_v13, %v308_v15  ;;  %v301_v28 = vadd.f32 %v398_v22, %v485_v9  ;;  %v309_v29 = vadd.f32 %v406_v24, %v485_v9  ;;  %v180_v30 = vpop.f32.mrb[3].mxu0  ;;  %v212_v32 = vpop.f32.mrb[3].mxu1 }
  0xdd   :  { %v330_v34 = vadd.f32 %v314_v17, %v298_v20  ;;  %v338_v35 = vadd.f32 %v322_v19, %v306_v21  ;;  %v299_v36 = vadd.f32 %v485_v9, %v180_v30  ;;  %v307_v37 = vadd.f32 %v485_v9, %v212_v32 }
  0xde   :  { %348 = vst [vmem:[%s603_s4 + $0x10] sm:$0xff] %v332_v26  ;;  %356 = vst [vmem:[%s603_s4 + $0x50] sm:$0xff] %v340_v27  ;;  %v333_v38 = vadd.f32 %v317_v23, %v301_v28  ;;  %v341_v39 = vadd.f32 %v325_v25, %v309_v29 }
  0xdf   :  { %346 = vst [vmem:[%s603_s4] sm:$0xff] %v330_v34  ;;  %354 = vst [vmem:[%s603_s4 + $0x40] sm:$0xff] %v338_v35  ;;  %v331_v40 = vadd.f32 %v315_v31, %v299_v36  ;;  %v339_v41 = vadd.f32 %v323_v33, %v307_v37 }
  0xe0   :  { %349 = vst [vmem:[%s603_s4 + $0x18] sm:$0xff] %v333_v38  ;;  %357 = vst [vmem:[%s603_s4 + $0x58] sm:$0xff] %v341_v39 }
  0xe1   :  { %347 = vst [vmem:[%s603_s4 + $0x8] sm:$0xff] %v331_v40  ;;  %355 = vst [vmem:[%s603_s4 + $0x48] sm:$0xff] %v339_v41  ;;  %v401_v42 = vpop.f32.mrb[4].mxu0  ;;  %v409_v44 = vpop.f32.mrb[4].mxu1 }
  0xe2   :  { %v304_v46 = vadd.f32 %v401_v42, %v485_v9  ;;  %v312_v47 = vadd.f32 %v409_v44, %v485_v9  ;;  %v193_v48 = vpop.f32.mrb[5].mxu0  ;;  %v225_v50 = vpop.f32.mrb[5].mxu1 }
  0xe3   :  { %v302_v52 = vadd.f32 %v485_v9, %v193_v48  ;;  %v310_v53 = vadd.f32 %v485_v9, %v225_v50  ;;  %v402_v54 = vpop.f32.mrb[6].mxu0  ;;  %v410_v56 = vpop.f32.mrb[6].mxu1 }
  0xe4   :  { %v336_v58 = vadd.f32 %v320_v43, %v304_v46  ;;  %v344_v59 = vadd.f32 %v328_v45, %v312_v47  ;;  %v305_v60 = vadd.f32 %v402_v54, %v485_v9  ;;  %v313_v61 = vadd.f32 %v410_v56, %v485_v9  ;;  %v196_v62 = vpop.f32.mrb[7].mxu0  ;;  %v228_v0 = vpop.f32.mrb[7].mxu1 }
  0xe5   :  { %v334_v2 = vadd.f32 %v318_v49, %v302_v52  ;;  %v342_v3 = vadd.f32 %v326_v51, %v310_v53  ;;  %v303_v4 = vadd.f32 %v485_v9, %v196_v62  ;;  %v311_v5 = vadd.f32 %v485_v9, %v228_v0 }
  0xe6   :  { %352 = vst [vmem:[%s603_s4 + $0x30] sm:$0xff] %v336_v58  ;;  %360 = vst [vmem:[%s603_s4 + $0x70] sm:$0xff] %v344_v59  ;;  %v337_v6 = vadd.f32 %v321_v55, %v305_v60  ;;  %v345_v7 = vadd.f32 %v329_v57, %v313_v61 }
  0xe7   :  { %350 = vst [vmem:[%s603_s4 + $0x20] sm:$0xff] %v334_v2  ;;  %358 = vst [vmem:[%s603_s4 + $0x60] sm:$0xff] %v342_v3  ;;  %v335_v8 = vadd.f32 %v319_v63, %v303_v4  ;;  %v343_v9 = vadd.f32 %v327_v1, %v311_v5 }
  0xe8   :  { %353 = vst [vmem:[%s603_s4 + $0x38] sm:$0xff] %v337_v6  ;;  %361 = vst [vmem:[%s603_s4 + $0x78] sm:$0xff] %v345_v7 }
  0xe9   :  { %351 = vst [vmem:[%s603_s4 + $0x28] sm:$0xff] %v335_v8  ;;  %359 = vst [vmem:[%s603_s4 + $0x68] sm:$0xff] %v343_v9 }

// kernel: a_call__.15
= control target key start
LH: loop header
LB: loop body
LE: loop exit
PB: predicated region body
PF: predicated region fallthrough
CT: control target
= control target key end

     0   :  { %v553_v1 = vmov 0   ;;  %vm212_vm0 = vcmask 130048   ;;  %s693_s0 = inlined_call_operand.vmem [shape: bf16[128,144], index: 0, kind: input, shape index: {}]   ;;  %s694_s1 = inlined_call_operand.vmem [shape: bf16[144,128], index: 1, kind: input, shape index: {}]   ;;  %s695_s2 = inlined_call_operand.vmem [shape: f32[1,128], index: 2, kind: input, shape index: {}]   ;;  %s696_s3 = inlined_call_operand.hbm [shape: f32[128,128], index: 3, kind: output, shape index: {}]  }
   0x1   :  { %v496_v0 = vld [vmem:[%s694_s1] sm:$0xff]   ;;  %237 = vmatprep.subr.bf16.mxu0 %v553_v1  ;;  %474 = vmatprep.subr.bf16.mxu1 %v553_v1  ;;  %v497_v2 = vld [vmem:[%s694_s1 + $0x8] sm:$0xff]   ;;  %v498_v3 = vld [vmem:[%s694_s1 + $0x10] sm:$0xff]  }
   0x2   :  { %238 = vmatpush1.bf16.msra.mxu0 %v496_v0  ;;  %483 = vmatpush1.bf16.msra.mxu1 %v496_v0  ;;  %v499_v4 = vld [vmem:[%s694_s1 + $0x18] sm:$0xff]   ;;  %v507_v5 = vld [vmem:[%s693_s0 + $0x4] ss:$8 sps:$4 sm:$0xff]  }
   0x3   :  { %239 = vmatprep.subr.bf16.mxu0 %v553_v1  ;;  %475 = vmatprep.subr.bf16.mxu1 %v553_v1  ;;  %v510_v6 = vld [vmem:[%s693_s0 + $0x44] ss:$8 sps:$4 sm:$0xff]  }
   0x4   :  { %465 = vmatprep.mubr.msk.bf16.mxu0 %vm212_vm0, %v507_v5  ;;  %469 = vmatprep.mubr.msk.bf16.mxu1 %vm212_vm0, %v510_v6  ;;  %v500_v7 = vld [vmem:[%s694_s1 + $0x20] sm:$0xff]   ;;  %v501_v8 = vld [vmem:[%s694_s1 + $0x28] sm:$0xff]  }
   0x6   :  { %240 = vmatpush1.bf16.msra.mxu0 %v497_v2  ;;  %484 = vmatpush1.bf16.msra.mxu1 %v497_v2 }
   0x7   :  { %241 = vmatprep.subr.bf16.mxu0 %v553_v1  ;;  %476 = vmatprep.subr.bf16.mxu1 %v553_v1 }
   0xa   :  { %242 = vmatpush1.bf16.msra.mxu0 %v498_v3  ;;  %485 = vmatpush1.bf16.msra.mxu1 %v498_v3 }
   0xb   :  { %243 = vmatprep.subr.bf16.mxu0 %v553_v1  ;;  %477 = vmatprep.subr.bf16.mxu1 %v553_v1 }
   0xe   :  { %244 = vmatpush1.bf16.msra.mxu0 %v499_v4  ;;  %486 = vmatpush1.bf16.msra.mxu1 %v499_v4 }
   0xf   :  { %245 = vmatprep.subr.bf16.mxu0 %v553_v1  ;;  %478 = vmatprep.subr.bf16.mxu1 %v553_v1 }
  0x12   :  { %246 = vmatpush1.bf16.msra.mxu0 %v500_v7  ;;  %487 = vmatpush1.bf16.msra.mxu1 %v500_v7 }
  0x13   :  { %247 = vmatprep.subr.bf16.mxu0 %v553_v1  ;;  %479 = vmatprep.subr.bf16.mxu1 %v553_v1 }
  0x14   :  { %8 = vsyncpa [#allocation4], 0  ;;  %v502_v9 = vld [vmem:[%s694_s1 + $0x30] sm:$0xff]   ;;  %v503_v10 = vld [vmem:[%s694_s1 + $0x38] sm:$0xff]  }
  0x15   :  { %v504_v11 = vld [vmem:[%s694_s1 + $0x40] sm:$0xff]   ;;  %v511_v14 = vld [vmem:[%s693_s0 + $0x14] ss:$8 sps:$4 sm:$0xff]   ;;  %v515_v16 = vld [vmem:[%s693_s0 + $0x10] ss:$8 sps:$4 sm:$0xff]  }
  0x16   :  { %248 = vmatpush1.bf16.msra.mxu0 %v501_v8  ;;  %488 = vmatpush1.bf16.msra.mxu1 %v501_v8  ;;  %v505_v12 = vld [vmem:[%s693_s0] ss:$8 sps:$4 sm:$0xff]   ;;  %v513_v15 = vld [vmem:[%s693_s0 + $0x54] ss:$8 sps:$4 sm:$0xff]   ;;  %v516_v17 = vld [vmem:[%s693_s0 + $0x50] ss:$8 sps:$4 sm:$0xff]  }
  0x17   :  { %249 = vmatprep.subr.bf16.mxu0 %v553_v1  ;;  %480 = vmatprep.subr.bf16.mxu1 %v553_v1  ;;  %v508_v13 = vld [vmem:[%s693_s0 + $0x40] ss:$8 sps:$4 sm:$0xff]   ;;  %v517_v18 = vld [vmem:[%s693_s0 + $0x24] ss:$8 sps:$4 sm:$0xff]   ;;  %v523_v22 = vld [vmem:[%s693_s0 + $0x34] ss:$8 sps:$4 sm:$0xff]  }
  0x18   :  { %v519_v19 = vld [vmem:[%s693_s0 + $0x64] ss:$8 sps:$4 sm:$0xff]   ;;  %v521_v20 = vld [vmem:[%s693_s0 + $0x20] ss:$8 sps:$4 sm:$0xff]   ;;  %v525_v23 = vld [vmem:[%s693_s0 + $0x74] ss:$8 sps:$4 sm:$0xff]  }
  0x19   :  { %v522_v21 = vld [vmem:[%s693_s0 + $0x60] ss:$8 sps:$4 sm:$0xff]   ;;  %v527_v24 = vld [vmem:[%s693_s0 + $0x30] ss:$8 sps:$4 sm:$0xff]  }
  0x1a   :  { %250 = vmatpush1.bf16.msra.mxu0 %v502_v9  ;;  %489 = vmatpush1.bf16.msra.mxu1 %v502_v9  ;;  %v528_v25 = vld [vmem:[%s693_s0 + $0x70] ss:$8 sps:$4 sm:$0xff]   ;;  %v663_v26 = vld [vmem:[%s695_s2] ss:$0 sm:$0xff]  ;;  %s554_s0 = smov [#allocation3]  }
  0x1b   :  { %251 = vmatprep.subr.bf16.mxu0 %v553_v1  ;;  %481 = vmatprep.subr.bf16.mxu1 %v553_v1  ;;  %s429_s2 = sshll.u32 %s554_s0, 4  ;;  %s430_s2 = int_to_ptr.vmem [resolvable:$true] %s429_s2 }
  0x1c   :  { %s529_s9 = scalar_lea.vmem %s430_s2, 2048  ;;  %p534_p1 = scmp.lt.s32.totalorder %s430_s2, %s430_s2 }
  0x1d   :  { %p530_p0 = scmp.ne.s32.totalorder %s430_s2, %s529_s9  ;;  %p535_p2 = scmp.lt.s32.totalorder %s529_s9, %s529_s9 }
  0x1e   :  { %252 = vmatpush1.bf16.msra.mxu0 %v503_v10  ;;  %490 = vmatpush1.bf16.msra.mxu1 %v503_v10 }
  0x1f   :  { %253 = vmatprep.subr.bf16.mxu0 %v553_v1  ;;  %482 = vmatprep.subr.bf16.mxu1 %v553_v1  ;;  %p536_p3 = por %p535_p2, %p534_p1 }
  0x21   :  { %p537_p4 = pnand %p536_p3, %p530_p0 }
  0x22   :  { %254 = vmatpush1.bf16.msra.mxu0 %v504_v11  ;;  %491 = vmatpush1.bf16.msra.mxu1 %v504_v11 }
  0x25   :  { %270 = vmatmul.mubr.bf16.vlgmr.msra.gmra.mrb[0].mxu0 %v505_v12  ;;  %302 = vmatmul.mubr.bf16.vlgmr.msra.gmra.mrb[0].mxu1 %v508_v13 }
  0x26   :  { %466 = vmatprep.mubr.msk.bf16.mxu0 %vm212_vm0, %v511_v14  ;;  %470 = vmatprep.mubr.msk.bf16.mxu1 %vm212_vm0, %v513_v15 }
  0x2d   :  { %278 = vmatmul.mubr.bf16.gmra.mrb[4].mxu0 %v515_v16  ;;  %310 = vmatmul.mubr.bf16.gmra.mrb[4].mxu1 %v516_v17 }
  0x2e   :  { %467 = vmatprep.mubr.msk.bf16.mxu0 %vm212_vm0, %v517_v18  ;;  %471 = vmatprep.mubr.msk.bf16.mxu1 %vm212_vm0, %v519_v19 }
  0x35   :  { %286 = vmatmul.mubr.bf16.gmra.mrb[8].mxu0 %v521_v20  ;;  %318 = vmatmul.mubr.bf16.gmra.mrb[8].mxu1 %v522_v21 }
  0x36   :  { %468 = vmatprep.mubr.msk.bf16.mxu0 %vm212_vm0, %v523_v22  ;;  %472 = vmatprep.mubr.msk.bf16.mxu1 %vm212_vm0, %v525_v23 }
  0x3d   :  { %294 = vmatmul.mubr.bf16.gmra.mrb[12].mxu0 %v527_v24  ;;  %326 = vmatmul.mubr.bf16.gmra.mrb[12].mxu1 %v528_v25 }
  0xf8   :  { %v271_v27 = vpop.f32.mrb[0].mxu0  ;;  %v303_v28 = vpop.f32.mrb[0].mxu1 }
  0xf9   :  { %v392_v29 = vadd.f32 %v663_v26, %v271_v27  ;;  %v400_v30 = vadd.f32 %v663_v26, %v303_v28  ;;  %v273_v31 = vpop.f32.mrb[1].mxu0  ;;  %v305_v32 = vpop.f32.mrb[1].mxu1 }
  0xfa   :  { %v274_v33 = vpop.f32.mrb[2].mxu0  ;;  %v306_v34 = vpop.f32.mrb[2].mxu1 }
  0xfb   :  { %408 = vst [vmem:[#allocation3] sm:$0xff] %v392_v29  ;;  %416 = vst [vmem:[#allocation3 + $0x40] sm:$0xff] %v400_v30  ;;  %v393_v35 = vadd.f32 %v663_v26, %v274_v33  ;;  %v401_v36 = vadd.f32 %v663_v26, %v306_v34  ;;  %v276_v37 = vpop.f32.mrb[3].mxu0  ;;  %v308_v38 = vpop.f32.mrb[3].mxu1 }
  0xfd   :  { %409 = vst [vmem:[#allocation3 + $0x8] sm:$0xff] %v393_v35  ;;  %417 = vst [vmem:[#allocation3 + $0x48] sm:$0xff] %v401_v36 }
 0x100   :  { %v279_v39 = vpop.f32.mrb[4].mxu0  ;;  %v311_v40 = vpop.f32.mrb[4].mxu1 }
 0x101   :  { %v394_v41 = vadd.f32 %v663_v26, %v279_v39  ;;  %v402_v42 = vadd.f32 %v663_v26, %v311_v40  ;;  %v281_v43 = vpop.f32.mrb[5].mxu0  ;;  %v313_v44 = vpop.f32.mrb[5].mxu1 }
 0x102   :  { %v282_v45 = vpop.f32.mrb[6].mxu0  ;;  %v314_v46 = vpop.f32.mrb[6].mxu1 }
 0x103   :  { %410 = vst [vmem:[#allocation3 + $0x10] sm:$0xff] %v394_v41  ;;  %418 = vst [vmem:[#allocation3 + $0x50] sm:$0xff] %v402_v42  ;;  %v395_v47 = vadd.f32 %v663_v26, %v282_v45  ;;  %v403_v48 = vadd.f32 %v663_v26, %v314_v46  ;;  %v284_v49 = vpop.f32.mrb[7].mxu0  ;;  %v316_v50 = vpop.f32.mrb[7].mxu1 }
 0x105   :  { %411 = vst [vmem:[#allocation3 + $0x18] sm:$0xff] %v395_v47  ;;  %419 = vst [vmem:[#allocation3 + $0x58] sm:$0xff] %v403_v48 }
 0x108   :  { %v287_v51 = vpop.f32.mrb[8].mxu0  ;;  %v319_v52 = vpop.f32.mrb[8].mxu1 }
 0x109   :  { %v396_v53 = vadd.f32 %v663_v26, %v287_v51  ;;  %v404_v54 = vadd.f32 %v663_v26, %v319_v52  ;;  %v289_v55 = vpop.f32.mrb[9].mxu0  ;;  %v321_v56 = vpop.f32.mrb[9].mxu1 }
 0x10a   :  { %v290_v57 = vpop.f32.mrb[10].mxu0  ;;  %v322_v58 = vpop.f32.mrb[10].mxu1 }
 0x10b   :  { %412 = vst [vmem:[#allocation3 + $0x20] sm:$0xff] %v396_v53  ;;  %420 = vst [vmem:[#allocation3 + $0x60] sm:$0xff] %v404_v54  ;;  %v397_v59 = vadd.f32 %v663_v26, %v290_v57  ;;  %v405_v60 = vadd.f32 %v663_v26, %v322_v58  ;;  %v292_v61 = vpop.f32.mrb[11].mxu0  ;;  %v324_v62 = vpop.f32.mrb[11].mxu1 }
 0x10d   :  { %413 = vst [vmem:[#allocation3 + $0x28] sm:$0xff] %v397_v59  ;;  %421 = vst [vmem:[#allocation3 + $0x68] sm:$0xff] %v405_v60 }
 0x110   :  { %v295_v63 = vpop.f32.mrb[12].mxu0  ;;  %v327_v0 = vpop.f32.mrb[12].mxu1 }
 0x111   :  { %v398_v1 = vadd.f32 %v663_v26, %v295_v63  ;;  %v406_v2 = vadd.f32 %v663_v26, %v327_v0  ;;  %v297_v3 = vpop.f32.mrb[13].mxu0  ;;  %v329_v4 = vpop.f32.mrb[13].mxu1 }
 0x112   :  { %v298_v5 = vpop.f32.mrb[14].mxu0  ;;  %v330_v6 = vpop.f32.mrb[14].mxu1 }
 0x113   :  { %414 = vst [vmem:[#allocation3 + $0x30] sm:$0xff] %v398_v1  ;;  %422 = vst [vmem:[#allocation3 + $0x70] sm:$0xff] %v406_v2  ;;  %v399_v7 = vadd.f32 %v663_v26, %v298_v5  ;;  %v407_v8 = vadd.f32 %v663_v26, %v330_v6  ;;  %v300_v9 = vpop.f32.mrb[15].mxu0  ;;  %v332_v10 = vpop.f32.mrb[15].mxu1 }
 0x115   :  { %415 = vst [vmem:[#allocation3 + $0x38] sm:$0xff] %v399_v7  ;;  %423 = vst [vmem:[#allocation3 + $0x78] sm:$0xff] %v407_v8 }
 0x116   :  { %540 = shalt.err (!%p537_p4)
}
 0x117   :  { %s541_s12 = scalar_lea.hbm %s696_s3, 2048 }
 0x118   :  { %p542_p5 = scmp.ne.s32.totalorder %s696_s3, %s541_s12  ;;  %p545_p6 = scmp.lt.u32.totalorder %s541_s12, %s696_s3 }
 0x11a   :  { %p547_p7 = pnand %p545_p6, %p542_p5 }
 0x11c   :  { %550 = shalt.err (!%p547_p7)
}
 0x11d   :  { %s555_s16 = smov 128   ;;  %s556_s17 = smov 8  }
 0x11e   :  { %435 = dma.vmem_to_hbm [thread:$0]  %s430_s2, 2048, %s696_s3, [#allocation4], %s555_s16, %s555_s16, %s556_s17  }
 0x11f   :  { %551 = dma.done.wait [#allocation4], 2048  }
 0x120   :  { %552 = vsyncadd [#allocation4], 4294965248 }
 0x121   :  { %439 = vsyncpa [#allocation4], 1 }

</bundles_post_ra>
